<compile_context>
chip_gen: v7x
topology: tpu7x:2x2x1
jax: 0.10.0
libtpu: 0.0.40
codegen_flags: <defaults>
</compile_context>

<pallas_src>
import functools

import jax
import jax.numpy as jnp
from jax.experimental import pallas as pl
from jax.experimental.pallas import tpu as pltpu


def _cdiv(a, b):
    return -(-a // b)


def _round_up(x, m):
    return ((x + m - 1) // m) * m


def bn_stats_kernel(z_ref, p0_ref, out_ref, *, m_total):
    """Per-tile BatchNorm sufficient statistics of a = z @ proj0.

    z_ref  : (TM, K)  input rows (any dtype; cast to p0 dtype in-register)
    p0_ref : (K, N1)  gate projection (compute dtype)
    out_ref: (1, 2, N1) f32 -> [sum(a); sum(a*a)] for this tile (masked rows
             beyond m_total contribute zero).
    """
    tm = z_ref.shape[0]
    base = pl.program_id(0) * tm
    row = jax.lax.broadcasted_iota(jnp.int32, (tm, 1), 0) + base
    valid = row < m_total

    a = jnp.dot(z_ref[...].astype(p0_ref.dtype), p0_ref[...],
                preferred_element_type=jnp.float32)            # (TM, N1)
    a = jnp.where(valid, a, 0.0)
    s1 = jnp.sum(a, axis=0, keepdims=True)                     # (1, N1)
    s2 = jnp.sum(a * a, axis=0, keepdims=True)                 # (1, N1)
    out_ref[0] = jnp.concatenate([s1, s2], axis=0)             # (2, N1)


def tucker_mmoe_kernel(z_ref, p0s_ref, gb_ref, f1k_ref, f1b_ref, f0_ref,
                       core2_ref, out_ref, *, r1, o):
    """One M-tile of the Tucker-MMoE forward (hierarchy=1, bias folded).

    z_ref    : (TM, K)      input rows (cast per-tile to compute dtype)
    p0s_ref  : (K, N1)      BN-folded gate weights  (proj0 * istd)
    gb_ref   : (1, N1)      BN-folded gate bias     (-mean * istd), f32
    f1k_ref  : (K, RI)      input-mode factor F1[:K]
    f1b_ref  : (1, RI)      bias row F1[K], f32
    f0_ref   : (N1, R1)     expert-mode factor, f32
    core2_ref: (RI, R1*O)   Tucker core with the output factor pre-folded
    out_ref  : (TM, O)      output rows, f32
    """
    zc = z_ref[...].astype(p0s_ref.dtype)

    # Gate: BatchNorm folded into the weights, softmax in f32.
    ah = jnp.dot(zc, p0s_ref[...],
                 preferred_element_type=jnp.float32) + gb_ref[...]   # (TM, N1)
    ah = ah - jnp.max(ah, axis=-1, keepdims=True)
    e = jnp.exp(ah)
    a1 = e / jnp.sum(e, axis=-1, keepdims=True)
    ar = jnp.dot(a1, f0_ref[...],
                 preferred_element_type=jnp.float32)                 # (TM, R1)

    # Input-mode projection (bias row of F1 added as a constant vector).
    zr = jnp.dot(zc, f1k_ref[...],
                 preferred_element_type=jnp.float32) + f1b_ref[...]  # (TM, RI)

    # One lane-dense MXU matmul against the (RI, R1*O) folded core.
    tmp = jnp.dot(zr.astype(core2_ref.dtype), core2_ref[...],
                  preferred_element_type=jnp.float32)                # (TM, R1*O)

    # Expert mixing: R1 cheap VPU multiply-adds on O-wide lane slices.
    acc = ar[:, 0:1] * tmp[:, 0:o]
    for r in range(1, r1):
        acc = acc + ar[:, r:r + 1] * tmp[:, r * o:(r + 1) * o]
    out_ref[...] = acc.astype(out_ref.dtype)


def tucker_mmoe(z, params, *, eps=1e-5, compute_dtype=jnp.bfloat16,
                block_m=1024):
    """z: (batch, tokens, input_dim) or (batch, input_dim).
    Returns (batch, tokens, output_dim), squeezed to (batch, output_dim) when
    tokens == 1 (matching the PyTorch module's squeeze(dim=1))."""
    if z.ndim == 2:
        z = z[:, None, :]
    b, t, k = z.shape
    m = b * t

    p0 = params["proj0"].astype(jnp.float32)      # (K, N1)
    f0 = params["factor0"].astype(jnp.float32)    # (N1, R1)
    f1 = params["factor1"].astype(jnp.float32)    # (K+1, RI)
    f2 = params["factor2"].astype(jnp.float32)    # (O, RO)
    core = params["core"].astype(jnp.float32)     # (R1, RI, RO)

    n1, r1 = f0.shape
    ri = f1.shape[1]
    o = f2.shape[0]

    # z read in place (no pad / cast copies); dtype handled in-kernel.
    zf = z.reshape(m, k)

    # --- M tiling: large tiles to amortize the ~0.35us per-grid-step overhead,
    # and at least two grid steps so the "parallel" axis shards across v7x's
    # two TensorCores.  Ragged last tiles are handled in-kernel (no jnp.pad).
    if m >= 2 * block_m:
        tm = block_m
    else:
        tm = max(8, _round_up(_cdiv(m, 2), 8))
    n_tiles = _cdiv(m, tm)

    dsem = pltpu.CompilerParams(dimension_semantics=("parallel",))
    p0c = p0.astype(compute_dtype)

    # --- Pass 1: BatchNorm1d batch statistics accumulated inside Pallas;
    # only the tiny (n_tiles, 2, N1) cross-tile reduce is left to XLA.
    partials = pl.pallas_call(
        functools.partial(bn_stats_kernel, m_total=m),
        out_shape=jax.ShapeDtypeStruct((n_tiles, 2, n1), jnp.float32),
        grid=(n_tiles,),
        in_specs=[
            pl.BlockSpec((tm, k), lambda i: (i, 0)),
            pl.BlockSpec((k, n1), lambda i: (0, 0)),
        ],
        out_specs=pl.BlockSpec((1, 2, n1), lambda i: (i, 0, 0)),
        compiler_params=dsem,
    )(zf, p0c)

    sums = jnp.sum(partials, axis=0)                       # (2, N1)
    mean = sums[0] / m
    # Moment form E[a^2] - mean^2 in f32 (BN means are near zero here);
    # guard against tiny negative round-off.
    var = jnp.maximum(sums[1] / m - mean * mean, 0.0)
    istd = jax.lax.rsqrt(var + eps)

    # --- Fold BatchNorm into the gate weights and pre-contract F2 into the
    # core (all tiny XLA ops on weight-sized arrays).
    p0s = (p0 * istd[None, :]).astype(compute_dtype)       # (K, N1)
    gate_bias = (-mean * istd)[None, :]                    # (1, N1) f32
    f1k = f1[:k, :].astype(compute_dtype)                  # (K, RI)
    f1_bias = f1[k:k + 1, :]                               # (1, RI) f32
    core_f2 = jnp.einsum("nir,or->nio", core, f2)          # (R1, RI, O)
    core2 = jnp.transpose(core_f2, (1, 0, 2)).reshape(ri, r1 * o)
    core2 = core2.astype(compute_dtype)

    # --- Pass 2: gate + Tucker contraction + expert mixing, tiled over M.
    out = pl.pallas_call(
        functools.partial(tucker_mmoe_kernel, r1=r1, o=o),
        out_shape=jax.ShapeDtypeStruct((m, o), jnp.float32),
        grid=(n_tiles,),
        in_specs=[
            pl.BlockSpec((tm, k), lambda i: (i, 0)),       # z tile
            pl.BlockSpec((k, n1), lambda i: (0, 0)),       # BN-folded gate weights
            pl.BlockSpec((1, n1), lambda i: (0, 0)),       # BN-folded gate bias
            pl.BlockSpec((k, ri), lambda i: (0, 0)),       # F1 (input mode)
            pl.BlockSpec((1, ri), lambda i: (0, 0)),       # F1 bias row
            pl.BlockSpec((n1, r1), lambda i: (0, 0)),      # F0 (expert mode)
            pl.BlockSpec((ri, r1 * o), lambda i: (0, 0)),  # folded core (lane-dense)
        ],
        out_specs=pl.BlockSpec((tm, o), lambda i: (i, 0)),
        compiler_params=dsem,
    )(zf, p0s, gate_bias, f1k, f1_bias, f0, core2)

    out = out.reshape(b, t, o)
    if t == 1:
        out = out[:, 0, :]
    return out


def tucker_mmoe_reference(z, params, *, eps=1e-5):
    """Pure-JAX f32 reference mirroring the PyTorch forward (hierarchy=1)."""
    if z.ndim == 2:
        z = z[:, None, :]
    b, t, _ = z.shape
    p0, f0, f1, f2, core = (params["proj0"], params["factor0"],
                            params["factor1"], params["factor2"], params["core"])
    a = jnp.einsum("btk,kn->btn", z, p0)
    mean = a.mean(axis=(0, 1), keepdims=True)
    var = ((a - mean) ** 2).mean(axis=(0, 1), keepdims=True)
    a1 = jax.nn.softmax((a - mean) / jnp.sqrt(var + eps), axis=-1)
    zb = jnp.concatenate([z, jnp.ones((b, t, 1), z.dtype)], axis=-1)
    out = jnp.einsum("nir,bti->btnr", core, zb @ f1)
    out = jnp.einsum("btnr,btn->btr", out, a1 @ f0)
    out = jnp.einsum("btr,or->bto", out, f2)
    if t == 1:
        out = out[:, 0, :]
    return out


if __name__ == "__main__":
    # Small shapes consistent with the module; M = 1024 -> two 512-row tiles.
    input_dim, output_dim = 32, 16
    expert_dims = [8]
    ranks = [8, 16, 16]          # [r_n1, r_i, r_o] -> R1*O = 128 (lane-dense)
    batch, tokens = 4, 256

    key = jax.random.PRNGKey(0)
    k_f0, k_f1, k_f2, k_p0, k_core, k_z = jax.random.split(key, 6)

    # factors[0] (expert mode): randn * 1.0 + 1.0
    f0 = jax.random.normal(k_f0, (expert_dims[0], ranks[0]), jnp.float32) + 1.0
    # factors[1] (input mode, input_dim + 1 rows): randn, row-wise L2 normalized
    f1 = jax.random.normal(k_f1, (input_dim + 1, ranks[1]), jnp.float32)
    f1 = f1 / jnp.linalg.norm(f1, axis=1, keepdims=True)
    # factors[2] (output mode): randn, row-wise L2 normalized
    f2 = jax.random.normal(k_f2, (output_dim, ranks[2]), jnp.float32)
    f2 = f2 / jnp.linalg.norm(f2, axis=1, keepdims=True)
    # projs[0]: PyTorch inits these to zeros; small randoms here so BN / softmax
    # are exercised non-degenerately.
    p0 = 0.1 * jax.random.normal(k_p0, (input_dim, expert_dims[0]), jnp.float32)
    # core: randn, globally L2 normalized
    core = jax.random.normal(k_core, tuple(ranks), jnp.float32)
    core = core / jnp.linalg.norm(core)

    params = {"proj0": p0, "factor0": f0, "factor1": f1, "factor2": f2,
              "core": core}

    z = jax.random.normal(k_z, (batch, tokens, input_dim), jnp.float32)
    ref = jax.block_until_ready(tucker_mmoe_reference(z, params))

    # f32 compute path: tight check against the reference.
    out32 = jax.block_until_ready(
        tucker_mmoe(z, params, compute_dtype=jnp.float32))
    assert out32.shape == (batch, tokens, output_dim), out32.shape
    assert jnp.allclose(out32, ref, atol=2e-4, rtol=2e-4), (
        float(jnp.max(jnp.abs(out32 - ref))))

    # bf16 compute path (HBM-bandwidth-optimized): loose relative-norm check.
    outbf = jax.block_until_ready(
        tucker_mmoe(z, params, compute_dtype=jnp.bfloat16))
    rel = float(jnp.linalg.norm(outbf - ref) / jnp.linalg.norm(ref))
    assert rel < 0.1, rel

    # 2-D input path (tokens dim added then squeezed, like the PyTorch module).
    z2 = jax.random.normal(jax.random.PRNGKey(1), (16, input_dim), jnp.float32)
    out2 = jax.block_until_ready(
        tucker_mmoe(z2, params, compute_dtype=jnp.float32))
    ref2 = tucker_mmoe_reference(z2, params)
    assert out2.shape == (16, output_dim), out2.shape
    assert jnp.allclose(out2, ref2, atol=2e-4, rtol=2e-4), (
        float(jnp.max(jnp.abs(out2 - ref2))))

    # Ragged M path (no padding; masked stats + clipped output writeback).
    z3 = jax.random.normal(jax.random.PRNGKey(2), (3, 50, input_dim), jnp.float32)
    out3 = jax.block_until_ready(
        tucker_mmoe(z3, params, compute_dtype=jnp.float32))
    ref3 = tucker_mmoe_reference(z3, params)
    assert out3.shape == (3, 50, output_dim), out3.shape
    assert jnp.allclose(out3, ref3, atol=2e-4, rtol=2e-4), (
        float(jnp.max(jnp.abs(out3 - ref3))))

    print("KERNEL_OK")
</pallas_src>

<mosaic_0001>
module attributes {stable_mosaic.version = 11 : i64} {
  func.func @bn_stats_kernel(%arg0: i32, %arg1: memref<512x32xf32, #tpu.memory_space<vmem>>, %arg2: memref<32x8xf32, #tpu.memory_space<vmem>>, %arg3: memref<1x2x8xf32, #tpu.memory_space<vmem>>) attributes {dimension_semantics = [#tpu.dimension_semantics<parallel>], iteration_bounds = array<i64: 2>, scalar_prefetch = 0 : i64, scratch_operands = 0 : i64, tpu.core_type = #tpu.core_type<tc>, window_params = [{transform_indices = @transform_0, window_bounds = array<i64: 512, 32>}, {pipeline_mode = #tpu.pipeline_mode<synchronous>, transform_indices = @transform_1, window_bounds = array<i64: 32, 8>}, {transform_indices = @transform_2, window_bounds = array<i64: 1, 2, 8>}]} {
    %c512_i32 = arith.constant 512 : i32
    %0 = arith.muli %arg0, %c512_i32 : i32
    %1 = tpu.iota {dimensions = array<i32: 0>} : vector<512x1xi32>
    %2 = vector.broadcast %0 : i32 to vector<512x1xi32>
    %3 = arith.addi %1, %2 : vector<512x1xi32>
    %c1024_i32 = arith.constant 1024 : i32
    %4 = vector.broadcast %c1024_i32 : i32 to vector<512x1xi32>
    %5 = arith.cmpi slt, %3, %4 : vector<512x1xi32>
    %c0 = arith.constant 0 : index
    %c0_0 = arith.constant 0 : index
    %6 = vector.load %arg1[%c0, %c0_0] : memref<512x32xf32, #tpu.memory_space<vmem>>, vector<512x32xf32>
    %c0_1 = arith.constant 0 : index
    %c0_2 = arith.constant 0 : index
    %7 = vector.load %arg2[%c0_1, %c0_2] : memref<32x8xf32, #tpu.memory_space<vmem>>, vector<32x8xf32>
    %cst = arith.constant dense<0.000000e+00> : vector<512x8xf32>
    %8 = tpu.matmul %6, %7, %cst {dimension_numbers = #tpu.dot_dimension_numbers<[1], [0], [0], [1], [0, 0, 1, 1], [], []>} : vector<512x32xf32>, vector<32x8xf32>, vector<512x8xf32> -> vector<512x8xf32>
    %cst_3 = arith.constant 0.000000e+00 : f32
    %9 = vector.shape_cast %5 : vector<512x1xi1> to vector<512x1xi1>
    %10 = vector.broadcast %9 : vector<512x1xi1> to vector<512x8xi1>
    %11 = vector.broadcast %cst_3 : f32 to vector<512x8xf32>
    %12 = arith.select %10, %8, %11 : vector<512x8xi1>, vector<512x8xf32>
    %cst_4 = arith.constant dense<0.000000e+00> : vector<8xf32>
    %13 = vector.multi_reduction <add>, %12, %cst_4 [0] : vector<512x8xf32> to vector<8xf32>
    %14 = vector.shape_cast %13 : vector<8xf32> to vector<1x8xf32>
    %15 = arith.mulf %12, %12 : vector<512x8xf32>
    %cst_5 = arith.constant dense<0.000000e+00> : vector<8xf32>
    %16 = vector.multi_reduction <add>, %15, %cst_5 [0] : vector<512x8xf32> to vector<8xf32>
    %17 = vector.shape_cast %16 : vector<8xf32> to vector<1x8xf32>
    %18 = tpu.concatenate %14, %17 in 0 : vector<1x8xf32>, vector<1x8xf32> -> vector<2x8xf32>
    %c0_6 = arith.constant 0 : index
    %c0_7 = arith.constant 0 : index
    %c0_8 = arith.constant 0 : index
    %19 = vector.load %arg3[%c0_6, %c0_7, %c0_8] : memref<1x2x8xf32, #tpu.memory_space<vmem>>, vector<1x2x8xf32>
    %20 = vector.shape_cast %19 : vector<1x2x8xf32> to vector<2x8xf32>
    %21 = vector.shape_cast %18 : vector<2x8xf32> to vector<1x2x8xf32>
    tpu.vector_store %arg3[%c0_6, %c0_7, %c0_8], %21 {strides = array<i32>} : memref<1x2x8xf32, #tpu.memory_space<vmem>>, vector<1x2x8xf32>,
    return
  }
  func.func @transform_0(%arg0: i32) -> (i32, i32) {
    %c0_i32 = arith.constant 0 : i32
    %c0_i32_0 = arith.constant 0 : i32
    return %arg0, %c0_i32 : i32, i32
  }
  func.func @transform_1(%arg0: i32) -> (i32, i32) {
    %c0_i32 = arith.constant 0 : i32
    %c0_i32_0 = arith.constant 0 : i32
    %c0_i32_1 = arith.constant 0 : i32
    return %c0_i32, %c0_i32_0 : i32, i32
  }
  func.func @transform_2(%arg0: i32) -> (i32, i32, i32) {
    %c0_i32 = arith.constant 0 : i32
    %c0_i32_0 = arith.constant 0 : i32
    %c0_i32_1 = arith.constant 0 : i32
    return %arg0, %c0_i32, %c0_i32_0 : i32, i32, i32
  }
}

</mosaic_0001>

<bundles_post_ra>
// kernel: tpu_custom_call.1
= control target key start
LH: loop header
LB: loop body
LE: loop exit
PB: predicated region body
PF: predicated region fallthrough
CT: control target
= control target key end

     0   :  { %7 = vsyncpa [#allocation3], 0  ;;  %s2813_s0 = inlined_call_operand.vmem [shape: f32[1024,32], index: 0, kind: input, shape index: {}]   ;;  %s2814_s1 = inlined_call_operand.vmem [shape: f32[32,8], index: 1, kind: input, shape index: {}]   ;;  %s2815_s2 = inlined_call_operand.hbm [shape: f32[2,2,8], index: 2, kind: output, shape index: {}]  }
   0x1   :  { %9 = vsyncpa [#allocation3 + $0x1], 0  ;;  %s1964_s9 = smov 0   ;;  %s1966_s10 = smov 0  }
   0x2   :  { %s1968_s11 = smov 0   ;;  %s1970_s12 = smov 0  }
   0x3 LB: > { %s1985_s13 = sadd.s32 4294967295, %s1946_s12   ;;  %s1585_s14 = sadd.s32 4294967294, %s1946_s12   ;;  %s1946_s12 = sphi %s1970_s12, %s2821_s12   ;;  %s1942_s11 = sphi %s1968_s11, %s2820_s11   ;;  %s1938_s10 = sphi %s1966_s10, %s2819_s10   ;;  %s1934_s9 = sphi %s1964_s9, %s2818_s9  }
   0x4   : > { %s1989_s15 = sadd.s32 1, %s1946_s12   ;;  %s69_s16 = sadd.s32 1, %s1942_s11 }
   0x5   : > { %s66_s17 = ssub.s32 %s1946_s12, %s1989_s15  ;;  %p79_p0 = scmp.ne.s32.totalorder %s1942_s11, %s1938_s10 }
   0x6   : > { %p67_p1 = scmp.eq.s32.totalorder %s66_s17, 0  ;;  %p80_p2 = scmp.eq.s32.totalorder %s1985_s13, 1 }
   0x7   : > { %p85_p3 = scmp.ne.s32.totalorder %s1938_s10, %s1934_s9  ;;  %p86_p4 = scmp.eq.s32.totalorder %s1585_s14, 1 }
   0x8   : > { %s2000_s18 = scalar_select %p67_p1, %s1942_s11, %s69_s16  }
   0x9   : > { %p2002_p5 = por %p80_p2, %p79_p0  ;;  %p2006_p6 = por %p86_p4, %p85_p3 }
   0xa   : > { %p1588_p7 = scmp.ge.s32.totalorder %s1946_s12, 1  ;;  %p116_p8 = scmp.lt.s32.totalorder %s1946_s12, 3 }
   0xc   : > { %p117_p9 = pnand %p1588_p7, %p116_p8 }
   0xd   : > { %v403_v0 = vld [vmem:[%s2814_s1] sm:$0xff] (!%p117_p9)  ;;  %v404_v1 = vld [vmem:[%s2814_s1 + $0x8] sm:$0xff] (!%p117_p9)  ;;  %v405_v2 = vld [vmem:[%s2814_s1 + $0x10] sm:$0xff] (!%p117_p9)  ;;  %s1590_s27 = sshll.u32 (!%p117_p9), %s1985_s13, 6  ;;  %vm407_vm0 = vcmask (!%p117_p9), 261120   ;;  %s1592_s6 = sshll.u32 (!%p117_p9), %s1985_s13, 9 }
   0xe   : > { %120 = sbr.rel (%p117_p9) target bundleno = 404 (0x194), region = 28  ;;  %v1833_v3 = vpack.c.bf16 (!%p117_p9), %v404_v1, %v403_v0  ;;  %v406_v4 = vld [vmem:[%s2814_s1 + $0x18] sm:$0xff] (!%p117_p9)  ;;  %p139_p10 = scmp.lt.s32.totalorder (!%p117_p9), %s1590_s27, 127  ;;  %vm1177_vm2 = vcmask (!%p117_p9), 64512  }
   0xf   : > { %v1837_v5 = vpack.c.bf16 (!%p117_p9), %v406_v4, %v405_v2  ;;  %s135_s7 = sand.u32 (!%p117_p9), 1, %s1938_s10   ;;  %s1658_s14 = sshll.u32 (!%p117_p9), %s1985_s13, 5 }
  0x10   : > { %1834 = vmatprep.subr.bf16.mxu0 (!%p117_p9), %v1833_v3  ;;  %1841 = vmatprep.subr.bf16.mxu1 (!%p117_p9), %v1833_v3  ;;  %s1589_s8 = sshll.u32 (!%p117_p9), %s135_s7, 1  ;;  %s2771_s23 = scalar_lea.hbm (!%p117_p9), %s2815_s2, %s1658_s14 }
  0x11   : > { %1836 = vmatpush3.bf16.msra.mxu0 (!%p117_p9), %v1833_v3  ;;  %1843 = vmatpush3.bf16.msra.mxu1 (!%p117_p9), %v1833_v3  ;;  %s137_s16 = scalar_lea.vmem (!%p117_p9), [#allocation2], %s1589_s8  ;;  %s1513_s24 = scalar_lea.sflag (!%p117_p9), [#allocation3], %s135_s7 }
  0x12   : > { %1838 = vmatprep.subr.bf16.mxu0 (!%p117_p9), %v1837_v5  ;;  %1842 = vmatprep.subr.bf16.mxu1 (!%p117_p9), %v1837_v5  ;;  %s1526_s17 = sshll.u32 (!%p117_p9), %s137_s16, 4  ;;  %s1948_s25 = smov (!%p117_p9), [#allocation2]   ;;  %s2773_s17 = int_to_ptr.vmem [resolvable:$true] %s1526_s17 }
  0x13   : > { %s1884_s13 = scalar_lea.vmem (!%p117_p9), %s2773_s17, 32  ;;  %s1888_s26 = sshll.u32 (!%p117_p9), %s1948_s25, 4  ;;  %s1889_s26 = int_to_ptr.vmem [resolvable:$false] %s1888_s26 }
  0x14   : > { %p1885_p11 = scmp.ne.s32.totalorder (!%p117_p9), %s2773_s17, %s1884_s13  ;;  %p1891_p0 = scmp.lt.s32.totalorder (!%p117_p9), %s2773_s17, %s1889_s26 }
  0x15   : > { %s2823_s27 = smov (!%p139_p10, %s1590_s27), 127  ;;  %1840 = vmatpush3.bf16.msra.mxu0 %v1837_v5  ;;  %1844 = vmatpush3.bf16.msra.mxu1 %v1837_v5 }
  0x16   : > { %s1591_s30 = sshll.u32 %s2823_s27, 3  ;;  %p1886_p12 = pnand %p1885_p11, %p2002_p5 }
  0x17   : > { %s2028_s5 = scalar_lea.vmem %s2813_s0, %s1591_s30  ;;  %s1890_s27 = scalar_lea.vmem %s1889_s26, 64 }
  0x18   : > { %v339_v6 = vld [vmem:[%s2028_s5] sm:$0xff]  ;;  %v340_v7 = vld [vmem:[%s2028_s5 + $0x8] sm:$0xff]  ;;  %v341_v8 = vld [vmem:[%s2028_s5 + $0x10] sm:$0xff]  ;;  %p1887_p13 = pneg %p1886_p12  ;;  %p1892_p1 = scmp.lt.s32.totalorder %s1890_s27, %s1884_s13 }
  0x19   : > { %1737 = vmatprep.mubr.msk.f32.mxu0 %vm407_vm0, %v339_v6  ;;  %v342_v9 = vld [vmem:[%s2028_s5 + $0x18] sm:$0xff]  ;;  %v343_v10 = vld [vmem:[%s2028_s5 + $0x20] sm:$0xff]  ;;  %v344_v11 = vld [vmem:[%s2028_s5 + $0x28] sm:$0xff]  ;;  %v145_v6 = vlaneseq }
  0x1a   : > { %1738 = vmatmul.mubr.msk.f32.vlgmr.msra.gmra.mrb[0].mxu0 %vm407_vm0, %v340_v7  ;;  %v345_v12 = vld [vmem:[%s2028_s5 + $0x30] sm:$0xff]  ;;  %v371_v13 = vld [vmem:[%s2028_s5 + $0x100] sm:$0xff]  ;;  %v372_v14 = vld [vmem:[%s2028_s5 + $0x108] sm:$0xff]  ;;  %p1893_p2 = por %p1892_p1, %p1891_p0 }
  0x1b   : > { %1740 = vmatprep.mubr.msk.f32.mxu0 %vm407_vm0, %v341_v8  ;;  %1785 = vmatprep.mubr.msk.f32.mxu1 %vm407_vm0, %v371_v13  ;;  %v373_v15 = vld [vmem:[%s2028_s5 + $0x110] sm:$0xff]  ;;  %v346_v16 = vld [vmem:[%s2028_s5 + $0x38] sm:$0xff]  ;;  %v347_v18 = vld [vmem:[%s2028_s5 + $0x40] sm:$0xff]  ;;  %v2158_v7 = vshrl.u32 %v145_v6, 7 }
  0x1c   : > { %1786 = vmatmul.mubr.msk.f32.vlgmr.msra.gmra.mrb[0].mxu1 %vm407_vm0, %v372_v14  ;;  %v374_v17 = vld [vmem:[%s2028_s5 + $0x118] sm:$0xff]  ;;  %v375_v19 = vld [vmem:[%s2028_s5 + $0x120] sm:$0xff]  ;;  %v348_v20 = vld [vmem:[%s2028_s5 + $0x48] sm:$0xff]  ;;  %p1894_p3 = pnand %p1893_p2, %p1887_p13 }
  0x1d   : > { %1788 = vmatprep.mubr.msk.f32.mxu1 %vm407_vm0, %v373_v15  ;;  %v376_v21 = vld [vmem:[%s2028_s5 + $0x128] sm:$0xff]  ;;  %v349_v22 = vld [vmem:[%s2028_s5 + $0x50] sm:$0xff]  ;;  %v350_v24 = vld [vmem:[%s2028_s5 + $0x58] sm:$0xff]  ;;  %v147_v8 = vadd.s32 8, %v2158_v7  ;;  %v150_v13 = vadd.s32 32, %v2158_v7  ;;  %v153_v15 = vadd.s32 56, %v2158_v7 }
  0x1e   : > { %1741 = vmatmul.mubr.msk.f32.gmra.mrb[2].mxu0 %vm407_vm0, %v342_v9  ;;  %v377_v23 = vld [vmem:[%s2028_s5 + $0x130] sm:$0xff]  ;;  %v378_v25 = vld [vmem:[%s2028_s5 + $0x138] sm:$0xff]  ;;  %v351_v26 = vld [vmem:[%s2028_s5 + $0x60] sm:$0xff]  ;;  %v2162_v9 = vstv %s1592_s6 }
  0x1f   : > { %1743 = vmatprep.mubr.msk.f32.mxu0 %vm407_vm0, %v343_v10  ;;  %v379_v27 = vld [vmem:[%s2028_s5 + $0x140] sm:$0xff]  ;;  %v352_v28 = vld [vmem:[%s2028_s5 + $0x68] sm:$0xff]  ;;  %v353_v30 = vld [vmem:[%s2028_s5 + $0x70] sm:$0xff]  ;;  %v149_v10 = vadd.s32 24, %v2158_v7  ;;  %v212_v14 = vadd.s32 %v2162_v9, %v147_v8 }
  0x20   : > { %1789 = vmatmul.mubr.msk.f32.gmra.mrb[2].mxu1 %vm407_vm0, %v374_v17  ;;  %v380_v29 = vld [vmem:[%s2028_s5 + $0x148] sm:$0xff]  ;;  %v381_v31 = vld [vmem:[%s2028_s5 + $0x150] sm:$0xff]  ;;  %v354_v32 = vld [vmem:[%s2028_s5 + $0x78] sm:$0xff]  ;;  %v152_v17 = vadd.s32 48, %v2158_v7 }
  0x21   : > { %1791 = vmatprep.mubr.msk.f32.mxu1 %vm407_vm0, %v375_v19  ;;  %v382_v33 = vld [vmem:[%s2028_s5 + $0x158] sm:$0xff]  ;;  %v355_v34 = vld [vmem:[%s2028_s5 + $0x80] sm:$0xff]  ;;  %v356_v36 = vld [vmem:[%s2028_s5 + $0x88] sm:$0xff]  ;;  %vm276_vm1 = vcmp.lt.s32.totalorder %v212_v14, 1024 }
  0x22   : > { %1744 = vmatmul.mubr.msk.f32.gmra.mrb[4].mxu0 %vm407_vm0, %v344_v11  ;;  %v383_v35 = vld [vmem:[%s2028_s5 + $0x160] sm:$0xff]  ;;  %v384_v37 = vld [vmem:[%s2028_s5 + $0x168] sm:$0xff]  ;;  %v357_v38 = vld [vmem:[%s2028_s5 + $0x90] sm:$0xff]  ;;  %v148_v11 = vadd.s32 16, %v2158_v7 }
  0x23   : > { %1746 = vmatprep.mubr.msk.f32.mxu0 %vm407_vm0, %v345_v12  ;;  %v385_v39 = vld [vmem:[%s2028_s5 + $0x170] sm:$0xff]  ;;  %v358_v40 = vld [vmem:[%s2028_s5 + $0x98] sm:$0xff]  ;;  %v359_v42 = vld [vmem:[%s2028_s5 + $0xa0] sm:$0xff]  ;;  %v151_v12 = vadd.s32 40, %v2158_v7 }
  0x24   : > { %1792 = vmatmul.mubr.msk.f32.gmra.mrb[4].mxu1 %vm407_vm0, %v376_v21  ;;  %v386_v41 = vld [vmem:[%s2028_s5 + $0x178] sm:$0xff]  ;;  %v387_v43 = vld [vmem:[%s2028_s5 + $0x180] sm:$0xff]  ;;  %v360_v44 = vld [vmem:[%s2028_s5 + $0xa8] sm:$0xff]  ;;  %v213_v19 = vadd.s32 %v2162_v9, %v148_v11  ;;  %v2177_v21 = vadd.s32 %v2162_v9, %v150_v13 }
  0x25   : > { %1794 = vmatprep.mubr.msk.f32.mxu1 %vm407_vm0, %v377_v23  ;;  %v388_v45 = vld [vmem:[%s2028_s5 + $0x188] sm:$0xff]  ;;  %v361_v46 = vld [vmem:[%s2028_s5 + $0xb0] sm:$0xff]  ;;  %v362_v48 = vld [vmem:[%s2028_s5 + $0xb8] sm:$0xff]  ;;  %v155_v23 = vadd.s32 72, %v2158_v7 }
  0x26   : > { %1747 = vmatmul.mubr.msk.f32.gmra.mrb[6].mxu0 %vm407_vm0, %v346_v16  ;;  %v389_v47 = vld [vmem:[%s2028_s5 + $0x190] sm:$0xff]  ;;  %v390_v49 = vld [vmem:[%s2028_s5 + $0x198] sm:$0xff]  ;;  %v363_v50 = vld [vmem:[%s2028_s5 + $0xc0] sm:$0xff]  ;;  %v211_v16 = vadd.s32 %v2162_v9, %v2158_v7  ;;  %vm277_vm5 = vcmp.lt.s32.totalorder %v213_v19, 1024  ;;  %vm279_vm7 = vcmp.lt.s32.totalorder %v2177_v21, 1024 }
  0x27   : > { %1749 = vmatprep.mubr.msk.f32.mxu0 %vm407_vm0, %v347_v18  ;;  %v391_v51 = vld [vmem:[%s2028_s5 + $0x1a0] sm:$0xff]  ;;  %v364_v52 = vld [vmem:[%s2028_s5 + $0xc8] sm:$0xff]  ;;  %v365_v54 = vld [vmem:[%s2028_s5 + $0xd0] sm:$0xff]  ;;  %v214_v18 = vadd.s32 %v2162_v9, %v149_v10 }
  0x28   : > { %1795 = vmatmul.mubr.msk.f32.gmra.mrb[6].mxu1 %vm407_vm0, %v378_v25  ;;  %v392_v53 = vld [vmem:[%s2028_s5 + $0x1a8] sm:$0xff]  ;;  %v393_v55 = vld [vmem:[%s2028_s5 + $0x1b0] sm:$0xff]  ;;  %v366_v56 = vld [vmem:[%s2028_s5 + $0xd8] sm:$0xff]  ;;  %vm275_vm3 = vcmp.lt.s32.totalorder %v211_v16, 1024  ;;  %v154_v25 = vadd.s32 64, %v2158_v7 }
  0x29   : > { %1797 = vmatprep.mubr.msk.f32.mxu1 %vm407_vm0, %v379_v27  ;;  %v394_v57 = vld [vmem:[%s2028_s5 + $0x1b8] sm:$0xff]  ;;  %v367_v58 = vld [vmem:[%s2028_s5 + $0xe0] sm:$0xff]  ;;  %v368_v60 = vld [vmem:[%s2028_s5 + $0xe8] sm:$0xff]  ;;  %vm278_vm4 = vcmp.lt.s32.totalorder %v214_v18, 1024 }
  0x2a   : > { %1750 = vmatmul.mubr.msk.f32.gmra.mrb[8].mxu0 %vm407_vm0, %v348_v20  ;;  %v395_v59 = vld [vmem:[%s2028_s5 + $0x1c0] sm:$0xff]  ;;  %v396_v61 = vld [vmem:[%s2028_s5 + $0x1c8] sm:$0xff]  ;;  %v369_v62 = vld [vmem:[%s2028_s5 + $0xf0] sm:$0xff]  ;;  %v216_v20 = vadd.s32 %v2162_v9, %v151_v12  ;;  %v165_v12 = vadd.s32 152, %v2158_v7 }
  0x2b   : > { %1752 = vmatprep.mubr.msk.f32.mxu0 %vm407_vm0, %v349_v22  ;;  %v397_v63 = vld [vmem:[%s2028_s5 + $0x1d0] sm:$0xff]  ;;  %v370_v0 = vld [vmem:[%s2028_s5 + $0xf8] sm:$0xff]  ;;  %v399_v2 = vld [vmem:[%s2028_s5 + $0x1e0] sm:$0xff]  ;;  %v2180_v22 = vadd.s32 %v2162_v9, %v153_v15 }
  0x2c   : > { %1798 = vmatmul.mubr.msk.f32.gmra.mrb[8].mxu1 %vm407_vm0, %v380_v29  ;;  %v398_v1 = vld [vmem:[%s2028_s5 + $0x1d8] sm:$0xff]  ;;  %v400_v3 = vld [vmem:[%s2028_s5 + $0x1e8] sm:$0xff]  ;;  %v401_v4 = vld [vmem:[%s2028_s5 + $0x1f0] sm:$0xff]  ;;  %vm280_vm6 = vcmp.lt.s32.totalorder %v216_v20, 1024  ;;  %v157_v29 = vadd.s32 88, %v2158_v7 }
  0x2d   : > { %1800 = vmatprep.mubr.msk.f32.mxu1 %vm407_vm0, %v381_v31  ;;  %v402_v5 = vld [vmem:[%s2028_s5 + $0x1f8] sm:$0xff]  ;;  %vm282_vm8 = vcmp.lt.s32.totalorder %v2180_v22, 1024  ;;  %v167_v22 = vadd.s32 168, %v2158_v7 }
  0x2e   : > { %1753 = vmatmul.mubr.msk.f32.gmra.mrb[10].mxu0 %vm407_vm0, %v350_v24  ;;  %v2184_v24 = vadd.s32 %v2162_v9, %v152_v17 }
  0x2f   : > { %1755 = vmatprep.mubr.msk.f32.mxu0 %vm407_vm0, %v351_v26 }
  0x30   : > { %1801 = vmatmul.mubr.msk.f32.gmra.mrb[10].mxu1 %vm407_vm0, %v382_v33  ;;  %vm281_vm9 = vcmp.lt.s32.totalorder %v2184_v24, 1024  ;;  %v166_v24 = vadd.s32 160, %v2158_v7 }
  0x31   : > { %1803 = vmatprep.mubr.msk.f32.mxu1 %vm407_vm0, %v383_v35 }
  0x32   : > { %1756 = vmatmul.mubr.msk.f32.gmra.mrb[12].mxu0 %vm407_vm0, %v352_v28 }
  0x33   : > { %1758 = vmatprep.mubr.msk.f32.mxu0 %vm407_vm0, %v353_v30  ;;  %v156_v30 = vadd.s32 80, %v2158_v7 }
  0x34   : > { %1804 = vmatmul.mubr.msk.f32.gmra.mrb[12].mxu1 %vm407_vm0, %v384_v37  ;;  %v2198_v37 = vadd.s32 %v2162_v9, %v154_v25  ;;  %v164_v25 = vadd.s32 144, %v2158_v7 }
  0x35   : > { %1806 = vmatprep.mubr.msk.f32.mxu1 %vm407_vm0, %v385_v39 }
  0x36   : > { %1759 = vmatmul.mubr.msk.f32.gmra.mrb[14].mxu0 %vm407_vm0, %v354_v32  ;;  %vm283_vm11 = vcmp.lt.s32.totalorder %v2198_v37, 1024 }
  0x37   : > { %1761 = vmatprep.mubr.msk.f32.mxu0 %vm407_vm0, %v355_v34  ;;  %v2193_v34 = vadd.s32 %v2162_v9, %v155_v23 }
  0x38   : > { %1807 = vmatmul.mubr.msk.f32.gmra.mrb[14].mxu1 %vm407_vm0, %v386_v41  ;;  %v159_v41 = vadd.s32 104, %v2158_v7 }
  0x39   : > { %1809 = vmatprep.mubr.msk.f32.mxu1 %vm407_vm0, %v387_v43  ;;  %vm284_vm10 = vcmp.lt.s32.totalorder %v2193_v34, 1024 }
  0x3a   : > { %1762 = vmatmul.mubr.msk.f32.gmra.mrb[16].mxu0 %vm407_vm0, %v356_v36 }
  0x3b   : > { %1764 = vmatprep.mubr.msk.f32.mxu0 %vm407_vm0, %v357_v38 }
  0x3c   : > { %1810 = vmatmul.mubr.msk.f32.gmra.mrb[16].mxu1 %vm407_vm0, %v388_v45 }
  0x3d   : > { %1812 = vmatprep.mubr.msk.f32.mxu1 %vm407_vm0, %v389_v47  ;;  %v2209_v47 = vadd.s32 %v2162_v9, %v156_v30 }
  0x3e   : > { %1765 = vmatmul.mubr.msk.f32.gmra.mrb[18].mxu0 %vm407_vm0, %v358_v40 }
  0x3f   : > { %1767 = vmatprep.mubr.msk.f32.mxu0 %vm407_vm0, %v359_v42  ;;  %v158_v42 = vadd.s32 96, %v2158_v7  ;;  %vm285_vm13 = vcmp.lt.s32.totalorder %v2209_v47, 1024 }
  0x40   : > { %1813 = vmatmul.mubr.msk.f32.gmra.mrb[18].mxu1 %vm407_vm0, %v390_v49 }
  0x41   : > { %1815 = vmatprep.mubr.msk.f32.mxu1 %vm407_vm0, %v391_v51  ;;  %v160_v51 = vadd.s32 112, %v2158_v7 }
  0x42   : > { %1768 = vmatmul.mubr.msk.f32.gmra.mrb[20].mxu0 %vm407_vm0, %v360_v44 }
  0x43   : > { %1770 = vmatprep.mubr.msk.f32.mxu0 %vm407_vm0, %v361_v46  ;;  %v2206_v46 = vadd.s32 %v2162_v9, %v157_v29  ;;  %v2237_v6 = vadd.s32 %v2162_v9, %v160_v51  ;;  %v2283_v51 = vadd.s32 %v2162_v9, %v164_v25 }
  0x44   : > { %1816 = vmatmul.mubr.msk.f32.gmra.mrb[20].mxu1 %vm407_vm0, %v392_v53 }
  0x45   : > { %1818 = vmatprep.mubr.msk.f32.mxu1 %vm407_vm0, %v393_v55  ;;  %v163_v55 = vadd.s32 136, %v2158_v7  ;;  %vm286_vm12 = vcmp.lt.s32.totalorder %v2206_v46, 1024 }
  0x46   : > { %1771 = vmatmul.mubr.msk.f32.gmra.mrb[22].mxu0 %vm407_vm0, %v362_v48 }
  0x47   : > { %1773 = vmatprep.mubr.msk.f32.mxu0 %vm407_vm0, %v363_v50  ;;  %v161_v50 = vadd.s32 120, %v2158_v7  ;;  %v2244_v11 = vadd.s32 %v2162_v9, %v163_v55 }
  0x48   : > { %1819 = vmatmul.mubr.msk.f32.gmra.mrb[22].mxu1 %vm407_vm0, %v394_v57 }
  0x49   : > { %1821 = vmatprep.mubr.msk.f32.mxu1 %vm407_vm0, %v395_v59  ;;  %v2222_v59 = vadd.s32 %v2162_v9, %v158_v42 }
  0x4a   : > { %1774 = vmatmul.mubr.msk.f32.gmra.mrb[24].mxu0 %vm407_vm0, %v364_v52 }
  0x4b   : > { %1776 = vmatprep.mubr.msk.f32.mxu0 %vm407_vm0, %v365_v54  ;;  %vm287_vm15 = vcmp.lt.s32.totalorder %v2222_v59, 1024 }
  0x4c   : > { %1822 = vmatmul.mubr.msk.f32.gmra.mrb[24].mxu1 %vm407_vm0, %v396_v61 }
  0x4d   : > { %1824 = vmatprep.mubr.msk.f32.mxu1 %vm407_vm0, %v397_v63 }
  0x4e   : > { %1777 = vmatmul.mubr.msk.f32.gmra.mrb[26].mxu0 %vm407_vm0, %v366_v56 }
  0x4f   : > { %1779 = vmatprep.mubr.msk.f32.mxu0 %vm407_vm0, %v367_v58  ;;  %v2219_v58 = vadd.s32 %v2162_v9, %v159_v41 }
  0x50   : > { %1825 = vmatmul.mubr.msk.f32.gmra.mrb[26].mxu1 %vm407_vm0, %v398_v1  ;;  %v162_v1 = vadd.s32 128, %v2158_v7 }
  0x51   : > { %1827 = vmatprep.mubr.msk.f32.mxu1 %vm407_vm0, %v399_v2  ;;  %vm288_vm14 = vcmp.lt.s32.totalorder %v2219_v58, 1024 }
  0x52   : > { %1780 = vmatmul.mubr.msk.f32.gmra.mrb[28].mxu0 %vm407_vm0, %v368_v60  ;;  %v2253_v23 = vadd.s32 %v2162_v9, %v162_v1 }
  0x53   : > { %1782 = vmatprep.mubr.msk.f32.mxu0 %vm407_vm0, %v369_v62 }
  0x54   : > { %1828 = vmatmul.mubr.msk.f32.gmra.mrb[28].mxu1 %vm407_vm0, %v400_v3 }
  0x55   : > { %1830 = vmatprep.mubr.msk.f32.mxu1 %vm407_vm0, %v401_v4 }
  0x56   : > { %1783 = vmatmul.mubr.msk.f32.gmra.mrb[30].mxu0 %vm407_vm0, %v370_v0 }
  0x58   : > { %1831 = vmatmul.mubr.msk.f32.gmra.mrb[30].mxu1 %vm407_vm0, %v402_v5  ;;  %v2234_v5 = vadd.s32 %v2162_v9, %v161_v50 }
  0x5a   : > { %vm290_vm0 = vcmp.lt.s32.totalorder %v2234_v5, 1024 }
  0xed   : > { %v1739_v26 = vpop.f32.mrb[0].mxu0 }
  0xee   : > { %v1114_v27 = vsel %vm276_vm1, %v1739_v26, 0.0  ;;  %v666_v28 = vpop.f32.mrb[1].mxu0  ;;  %vm289_vm1 = vcmp.lt.s32.totalorder %v2237_v6, 1024 }
  0xef   : > { %v1179_v31 = vsel %vm1177_vm2, %v1114_v27, 0.0  ;;  %v1312_v32 = vmul.f32 %v1114_v27, %v1114_v27  ;;  %v1113_v33 = vsel %vm275_vm3, %v666_v28, 0.0  ;;  %v2224_v60 = vpop.f32.mrb[0].mxu1  ;;  %vm292_vm3 = vcmp.lt.s32.totalorder %v2244_v11, 1024 }
  0xf0   : > { %v1178_v35 = vsel %vm1177_vm2, %v1113_v33, 0.0  ;;  %v1311_v36 = vmul.f32 %v1113_v33, %v1113_v33  ;;  %v2230_v2 = vpop.f32.mrb[1].mxu1 }
  0xf1   : > { %v1376_v38 = vsel %vm1177_vm2, %v1312_v32, 0.0  ;;  %v1180_v39 = vadd.f32 %v1179_v31, %v1178_v35  ;;  %v1742_v40 = vpop.f32.mrb[2].mxu0 }
  0xf2   : > { %v1375_v43 = vsel %vm1177_vm2, %v1311_v36, 0.0  ;;  %v1116_v44 = vsel %vm278_vm4, %v1742_v40, 0.0  ;;  %v676_v45 = vpop.f32.mrb[3].mxu0  ;;  %vm291_vm4 = vcmp.lt.s32.totalorder %v2253_v23, 1024 }
  0xf3   : > { %v1377_v48 = vadd.f32 %v1376_v38, %v1375_v43  ;;  %v1115_v49 = vsel %vm277_vm5, %v676_v45, 0.0  ;;  %v1314_v52 = vmul.f32 %v1116_v44, %v1116_v44  ;;  %v1183_v61 = vsel %vm1177_vm2, %v1116_v44, 0.0  ;;  %v2248_v18 = vpop.f32.mrb[2].mxu1 }
  0xf4   : > { %v1181_v53 = vsel %vm1177_vm2, %v1115_v49, 0.0  ;;  %v1313_v54 = vmul.f32 %v1115_v49, %v1115_v49  ;;  %v2256_v26 = vpop.f32.mrb[3].mxu1 }
  0xf5   : > { %v1182_v56 = vadd.f32 %v1181_v53, %v1180_v39  ;;  %v1745_v57 = vpop.f32.mrb[4].mxu0  ;;  %v1380_v8 = vsel %vm1177_vm2, %v1314_v52, 0.0  ;;  %v2268_v39 = vadd.s32 %v2162_v9, %v165_v12  ;;  %v2286_v52 = vadd.s32 %v2162_v9, %v167_v22 }
  0xf6   : > { %v1378_v62 = vsel %vm1177_vm2, %v1313_v54, 0.0  ;;  %v1118_v63 = vsel %vm280_vm6, %v1745_v57, 0.0  ;;  %v686_v0 = vpop.f32.mrb[5].mxu0  ;;  %vm293_vm6 = vcmp.lt.s32.totalorder %v2283_v51, 1024 }
  0xf7   : > { %v1184_v3 = vadd.f32 %v1183_v61, %v1182_v56  ;;  %v1379_v4 = vadd.f32 %v1378_v62, %v1377_v48  ;;  %v1117_v10 = vsel %vm279_vm7, %v686_v0, 0.0  ;;  %v1316_v14 = vmul.f32 %v1118_v63, %v1118_v63  ;;  %v2271_v40 = vpop.f32.mrb[4].mxu1 }
  0xf8   : > { %v1185_v15 = vsel %vm1177_vm2, %v1117_v10, 0.0  ;;  %v1315_v16 = vmul.f32 %v1117_v10, %v1117_v10  ;;  %v1187_v27 = vsel %vm1177_vm2, %v1118_v63, 0.0  ;;  %v2276_v48 = vpop.f32.mrb[5].mxu1  ;;  %v2292_v61 = vadd.s32 %v2162_v9, %v166_v24 }
  0xf9   : > { %v1381_v13 = vadd.f32 %v1380_v8, %v1379_v4  ;;  %v1748_v17 = vpop.f32.mrb[6].mxu0  ;;  %v1186_v19 = vadd.f32 %v1185_v15, %v1184_v3  ;;  %v1384_v35 = vsel %vm1177_vm2, %v1316_v14, 0.0  ;;  %v169_v62 = vadd.s32 184, %v2158_v7 }
  0xfa   : > { %v1120_v20 = vsel %vm282_vm8, %v1748_v17, 0.0  ;;  %v696_v21 = vpop.f32.mrb[7].mxu0  ;;  %v1382_v28 = vsel %vm1177_vm2, %v1315_v16, 0.0  ;;  %v168_v14 = vadd.s32 176, %v2158_v7  ;;  %v171_v15 = vadd.s32 200, %v2158_v7 }
  0xfb   : > { %v1119_v29 = vsel %vm281_vm9, %v696_v21, 0.0  ;;  %v1383_v30 = vadd.f32 %v1382_v28, %v1381_v13  ;;  %v1188_v31 = vadd.f32 %v1187_v27, %v1186_v19  ;;  %v1318_v36 = vmul.f32 %v1120_v20, %v1120_v20  ;;  %v2295_v63 = vpop.f32.mrb[6].mxu1 }
  0xfc   : > { %v1189_v32 = vsel %vm1177_vm2, %v1119_v29, 0.0  ;;  %v1317_v33 = vmul.f32 %v1119_v29, %v1119_v29  ;;  %v1191_v49 = vsel %vm1177_vm2, %v1120_v20, 0.0  ;;  %v2300_v10 = vpop.f32.mrb[7].mxu1  ;;  %v2312_v47 = vadd.s32 %v2162_v9, %v169_v62 }
  0xfd   : > { %v1751_v38 = vpop.f32.mrb[8].mxu0  ;;  %v1190_v41 = vadd.f32 %v1189_v32, %v1188_v31  ;;  %v1385_v42 = vadd.f32 %v1384_v35, %v1383_v30  ;;  %v1388_v56 = vsel %vm1177_vm2, %v1318_v36, 0.0  ;;  %v170_v27 = vadd.s32 192, %v2158_v7 }
  0xfe   : > { %v1386_v43 = vsel %vm1177_vm2, %v1317_v33, 0.0  ;;  %v1122_v44 = vsel %vm284_vm10, %v1751_v38, 0.0  ;;  %v706_v45 = vpop.f32.mrb[9].mxu0  ;;  %vm294_vm5 = vcmp.lt.s32.totalorder %v2268_v39, 1024  ;;  %v2327_v38 = vadd.s32 %v2162_v9, %v168_v14 }
  0xff   : > { %v1121_v50 = vsel %vm283_vm11, %v706_v45, 0.0  ;;  %v1387_v53 = vadd.f32 %v1386_v43, %v1385_v42  ;;  %v1192_v54 = vadd.f32 %v1191_v49, %v1190_v41  ;;  %v1320_v57 = vmul.f32 %v1122_v44, %v1122_v44  ;;  %v2315_v28 = vpop.f32.mrb[8].mxu1 }
 0x100   : > { %v1193_v34 = vsel %vm1177_vm2, %v1121_v50, 0.0  ;;  %v1319_v55 = vmul.f32 %v1121_v50, %v1121_v50  ;;  %v1195_v12 = vsel %vm1177_vm2, %v1122_v44, 0.0  ;;  %v2320_v33 = vpop.f32.mrb[9].mxu1  ;;  %v2330_v24 = vadd.s32 %v2162_v9, %v171_v15 }
 0x101   : > { %v1754_v37 = vpop.f32.mrb[10].mxu0  ;;  %v1194_v0 = vadd.f32 %v1193_v34, %v1192_v54  ;;  %v1389_v1 = vadd.f32 %v1388_v56, %v1387_v53  ;;  %v1392_v20 = vsel %vm1177_vm2, %v1320_v57, 0.0  ;;  %v2336_v49 = vadd.s32 %v2162_v9, %v170_v27 }
 0x102   : > { %v1390_v3 = vsel %vm1177_vm2, %v1319_v55, 0.0  ;;  %v1124_v4 = vsel %vm286_vm12, %v1754_v37, 0.0  ;;  %v716_v8 = vpop.f32.mrb[11].mxu0  ;;  %v173_v50 = vadd.s32 216, %v2158_v7  ;;  %vm296_vm7 = vcmp.lt.s32.totalorder %v2286_v52, 1024 }
 0x103   : > { %v1123_v13 = vsel %vm285_vm13, %v716_v8, 0.0  ;;  %v1391_v16 = vadd.f32 %v1390_v3, %v1389_v1  ;;  %v1196_v17 = vadd.f32 %v1195_v12, %v1194_v0  ;;  %v1322_v21 = vmul.f32 %v1124_v4, %v1124_v4  ;;  %v2339_v53 = vpop.f32.mrb[10].mxu1 }
 0x104   : > { %v1197_v19 = vsel %vm1177_vm2, %v1123_v13, 0.0  ;;  %v1321_v46 = vmul.f32 %v1123_v13, %v1123_v13  ;;  %v1199_v35 = vsel %vm1177_vm2, %v1124_v4, 0.0  ;;  %v2344_v37 = vpop.f32.mrb[11].mxu1  ;;  %v172_v1 = vadd.s32 208, %v2158_v7 }
 0x105   : > { %v1757_v25 = vpop.f32.mrb[12].mxu0  ;;  %v1198_v29 = vadd.f32 %v1197_v19, %v1196_v17  ;;  %v1393_v22 = vadd.f32 %v1392_v20, %v1391_v16  ;;  %v1396_v44 = vsel %vm1177_vm2, %v1322_v21, 0.0  ;;  %v175_v3 = vadd.s32 232, %v2158_v7 }
 0x106   : > { %v1394_v30 = vsel %vm1177_vm2, %v1321_v46, 0.0  ;;  %v1126_v31 = vsel %vm288_vm14, %v1757_v25, 0.0  ;;  %v726_v32 = vpop.f32.mrb[13].mxu0  ;;  %vm295_vm8 = vcmp.lt.s32.totalorder %v2292_v61, 1024  ;;  %v2356_v6 = vadd.s32 %v2162_v9, %v173_v50 }
 0x107   : > { %v1125_v36 = vsel %vm287_vm15, %v726_v32, 0.0  ;;  %v1395_v41 = vadd.f32 %v1394_v30, %v1393_v22  ;;  %v1200_v42 = vadd.f32 %v1199_v35, %v1198_v29  ;;  %v1324_v45 = vmul.f32 %v1126_v31, %v1126_v31  ;;  %v2359_v17 = vpop.f32.mrb[12].mxu1 }
 0x108   : > { %v1201_v58 = vsel %vm1177_vm2, %v1125_v36, 0.0  ;;  %v1323_v43 = vmul.f32 %v1125_v36, %v1125_v36  ;;  %v1203_v62 = vsel %vm1177_vm2, %v1126_v31, 0.0  ;;  %v174_v16 = vadd.s32 224, %v2158_v7  ;;  %v2364_v27 = vpop.f32.mrb[13].mxu1 }
 0x109   : > { %v1760_v59 = vpop.f32.mrb[14].mxu0  ;;  %v1202_v54 = vadd.f32 %v1201_v58, %v1200_v42  ;;  %v1397_v34 = vadd.f32 %v1396_v44, %v1395_v41  ;;  %v1400_v13 = vsel %vm1177_vm2, %v1324_v45, 0.0  ;;  %vm298_vm9 = vcmp.lt.s32.totalorder %v2312_v47, 1024 }
 0x10a   : > { %v1398_v55 = vsel %vm1177_vm2, %v1323_v43, 0.0  ;;  %v1128_v56 = vsel %vm290_vm0, %v1760_v59, 0.0  ;;  %v736_v57 = vpop.f32.mrb[15].mxu0  ;;  %v2371_v30 = vadd.s32 %v2162_v9, %v172_v1  ;;  %v2374_v31 = vadd.s32 %v2162_v9, %v175_v3 }
 0x10b   : > { %v1127_v0 = vsel %vm289_vm1, %v736_v57, 0.0  ;;  %v1399_v4 = vadd.f32 %v1398_v55, %v1397_v34  ;;  %v1204_v8 = vadd.f32 %v1203_v62, %v1202_v54  ;;  %v1326_v14 = vmul.f32 %v1128_v56, %v1128_v56  ;;  %v2383_v44 = vpop.f32.mrb[14].mxu1 }
 0x10c   : > { %v1205_v12 = vsel %vm1177_vm2, %v1127_v0, 0.0  ;;  %v1325_v5 = vmul.f32 %v1127_v0, %v1127_v0  ;;  %v1207_v29 = vsel %vm1177_vm2, %v1128_v56, 0.0  ;;  %vm297_vm10 = vcmp.lt.s32.totalorder %v2327_v38, 1024  ;;  %v2388_v55 = vpop.f32.mrb[15].mxu1 }
 0x10d   : > { %v1763_v15 = vpop.f32.mrb[16].mxu0  ;;  %v1206_v19 = vadd.f32 %v1205_v12, %v1204_v8  ;;  %v1401_v46 = vadd.f32 %v1400_v13, %v1399_v4  ;;  %v1404_v41 = vsel %vm1177_vm2, %v1326_v14, 0.0  ;;  %v2380_v58 = vadd.s32 %v2162_v9, %v174_v16 }
 0x10e   : > { %v1402_v20 = vsel %vm1177_vm2, %v1325_v5, 0.0  ;;  %v1130_v21 = vsel %vm292_vm3, %v1763_v15, 0.0  ;;  %v746_v25 = vpop.f32.mrb[17].mxu0  ;;  %v177_v43 = vadd.s32 248, %v2158_v7  ;;  %vm300_vm11 = vcmp.lt.s32.totalorder %v2330_v24, 1024 }
 0x10f   : > { %v1129_v22 = vsel %vm291_vm4, %v746_v25, 0.0  ;;  %v1403_v32 = vadd.f32 %v1402_v20, %v1401_v46  ;;  %v1208_v35 = vadd.f32 %v1207_v29, %v1206_v19  ;;  %v1328_v42 = vmul.f32 %v1130_v21, %v1130_v21  ;;  %v2403_v14 = vpop.f32.mrb[16].mxu1 }
 0x110   : > { %v1209_v11 = vsel %vm1177_vm2, %v1129_v22, 0.0  ;;  %v1327_v36 = vmul.f32 %v1129_v22, %v1129_v22  ;;  %v1211_v56 = vsel %vm1177_vm2, %v1130_v21, 0.0  ;;  %v176_v62 = vadd.s32 240, %v2158_v7  ;;  %v2408_v21 = vpop.f32.mrb[17].mxu1 }
 0x111   : > { %v1766_v23 = vpop.f32.mrb[18].mxu0  ;;  %v1210_v45 = vadd.f32 %v1209_v11, %v1208_v35  ;;  %v1405_v59 = vadd.f32 %v1404_v41, %v1403_v32  ;;  %v179_v0 = vadd.s32 264, %v2158_v7  ;;  %vm299_vm12 = vcmp.lt.s32.totalorder %v2336_v49, 1024 }
 0x112   : > { %v1406_v50 = vsel %vm1177_vm2, %v1327_v36, 0.0  ;;  %v1132_v54 = vsel %vm294_vm5, %v1766_v23, 0.0  ;;  %v756_v34 = vpop.f32.mrb[19].mxu0  ;;  %v1408_v8 = vsel %vm1177_vm2, %v1328_v42, 0.0  ;;  %v2400_v51 = vadd.s32 %v2162_v9, %v177_v43 }
 0x113   : > { %v1131_v57 = vsel %vm293_vm6, %v756_v34, 0.0  ;;  %v1407_v1 = vadd.f32 %v1406_v50, %v1405_v59  ;;  %v1212_v3 = vadd.f32 %v1211_v56, %v1210_v45  ;;  %v1330_v12 = vmul.f32 %v1132_v54, %v1132_v54  ;;  %v2427_v45 = vpop.f32.mrb[18].mxu1 }
 0x114   : > { %v1213_v4 = vsel %vm1177_vm2, %v1131_v57, 0.0  ;;  %v1329_v39 = vmul.f32 %v1131_v57, %v1131_v57  ;;  %v178_v13 = vadd.s32 256, %v2158_v7  ;;  %v1215_v25 = vsel %vm1177_vm2, %v1132_v54, 0.0  ;;  %v2432_v57 = vpop.f32.mrb[19].mxu1 }
 0x115   : > { %v1769_v5 = vpop.f32.mrb[20].mxu0  ;;  %v1214_v15 = vadd.f32 %v1213_v4, %v1212_v3  ;;  %v1409_v16 = vadd.f32 %v1408_v8, %v1407_v1  ;;  %vm302_vm13 = vcmp.lt.s32.totalorder %v2356_v6, 1024  ;;  %v2415_v22 = vadd.s32 %v2162_v9, %v176_v62 }
 0x116   : > { %v1410_v19 = vsel %vm1177_vm2, %v1329_v39, 0.0  ;;  %v1134_v46 = vsel %vm296_vm7, %v1769_v5, 0.0  ;;  %v766_v20 = vpop.f32.mrb[21].mxu0  ;;  %v2418_v32 = vadd.s32 %v2162_v9, %v179_v0  ;;  %vm301_vm14 = vcmp.lt.s32.totalorder %v2371_v30, 1024 }
 0x117   : > { %v1133_v29 = vsel %vm295_vm8, %v766_v20, 0.0  ;;  %v1411_v35 = vadd.f32 %v1410_v19, %v1409_v16  ;;  %v1216_v11 = vadd.f32 %v1215_v25, %v1214_v15  ;;  %v1412_v41 = vsel %vm1177_vm2, %v1330_v12, 0.0  ;;  %v2447_v16 = vpop.f32.mrb[20].mxu1 }
 0x118   : > { %v1217_v52 = vsel %vm1177_vm2, %v1133_v29, 0.0  ;;  %v1331_v36 = vmul.f32 %v1133_v29, %v1133_v29  ;;  %v1332_v42 = vmul.f32 %v1134_v46, %v1134_v46  ;;  %v2424_v23 = vadd.s32 %v2162_v9, %v178_v13 }
 0x119   : > { %v1772_v61 = vpop.f32.mrb[22].mxu0  ;;  %v181_v43 = vadd.s32 280, %v2158_v7  ;;  %v1218_v59 = vadd.f32 %v1217_v52, %v1216_v11  ;;  %v1413_v50 = vadd.f32 %v1412_v41, %v1411_v35  ;;  %v1219_v62 = vsel %vm1177_vm2, %v1134_v46, 0.0  ;;  %v2453_v35 = vpop.f32.mrb[21].mxu1 }
 0x11a   : > { %v1414_v54 = vsel %vm1177_vm2, %v1331_v36, 0.0  ;;  %v1136_v34 = vsel %vm298_vm9, %v1772_v61, 0.0  ;;  %v776_v56 = vpop.f32.mrb[23].mxu0  ;;  %vm304_vm15 = vcmp.lt.s32.totalorder %v2374_v31, 1024  ;;  %v180_v1 = vadd.s32 272, %v2158_v7 }
 0x11b   : > { %v1135_v0 = vsel %vm297_vm10, %v776_v56, 0.0  ;;  %v183_v3 = vadd.s32 296, %v2158_v7  ;;  %v1415_v4 = vadd.f32 %v1414_v54, %v1413_v50  ;;  %v1220_v39 = vadd.f32 %v1219_v62, %v1218_v59  ;;  %v2472_v56 = vpop.f32.mrb[22].mxu1 }
 0x11c   : > { %v1221_v8 = vsel %vm1177_vm2, %v1135_v0, 0.0  ;;  %v1333_v47 = vmul.f32 %v1135_v0, %v1135_v0  ;;  %vm303_vm0 = vcmp.lt.s32.totalorder %v2380_v58, 1024  ;;  %v1416_v12 = vsel %vm1177_vm2, %v1332_v42, 0.0 }
 0x11d   : > { %v1334_v5 = vmul.f32 %v1136_v34, %v1136_v34  ;;  %v1775_v13 = vpop.f32.mrb[24].mxu0  ;;  %v2444_v38 = vadd.s32 %v2162_v9, %v181_v43  ;;  %v182_v15 = vadd.s32 288, %v2158_v7  ;;  %v1222_v19 = vadd.f32 %v1221_v8, %v1220_v39  ;;  %v2478_v39 = vpop.f32.mrb[23].mxu1 }
 0x11e   : > { %v1417_v46 = vadd.f32 %v1416_v12, %v1415_v4  ;;  %v1418_v20 = vsel %vm1177_vm2, %v1333_v47, 0.0  ;;  %v1138_v25 = vsel %vm300_vm11, %v1775_v13, 0.0  ;;  %v786_v29 = vpop.f32.mrb[25].mxu0  ;;  %vm307_vm1 = vcmp.lt.s32.totalorder %v2424_v23, 1024 }
 0x11f   : > { %v1223_v11 = vsel %vm1177_vm2, %v1136_v34, 0.0  ;;  %v1137_v52 = vsel %vm299_vm12, %v786_v29, 0.0  ;;  %vm306_vm3 = vcmp.lt.s32.totalorder %v2400_v51, 1024  ;;  %v2460_v36 = vadd.s32 %v2162_v9, %v180_v1 }
 0x120   : > { %v2463_v41 = vadd.s32 %v2162_v9, %v183_v3  ;;  %v1419_v24 = vadd.f32 %v1418_v20, %v1417_v46  ;;  %v1224_v42 = vadd.f32 %v1223_v11, %v1222_v19  ;;  %v1225_v61 = vsel %vm1177_vm2, %v1137_v52, 0.0  ;;  %v2492_v11 = vpop.f32.mrb[24].mxu1 }
 0x121   : > { %v1335_v43 = vmul.f32 %v1137_v52, %v1137_v52  ;;  %vm305_vm4 = vcmp.lt.s32.totalorder %v2415_v22, 1024  ;;  %v1420_v59 = vsel %vm1177_vm2, %v1334_v5, 0.0  ;;  %v1336_v50 = vmul.f32 %v1138_v25, %v1138_v25  ;;  %v1778_v49 = vpop.f32.mrb[26].mxu0 }
 0x122   : > { %v2469_v54 = vadd.s32 %v2162_v9, %v182_v15  ;;  %v185_v34 = vadd.s32 312, %v2158_v7  ;;  %v1226_v62 = vadd.f32 %v1225_v61, %v1224_v42  ;;  %v1421_v0 = vadd.f32 %v1420_v59, %v1419_v24  ;;  %v796_v4 = vpop.f32.mrb[27].mxu0  ;;  %v2497_v59 = vpop.f32.mrb[25].mxu1 }
 0x123   : > { %v1422_v1 = vsel %vm1177_vm2, %v1335_v43, 0.0  ;;  %v1140_v3 = vsel %vm302_vm13, %v1778_v49, 0.0  ;;  %vm308_vm5 = vcmp.lt.s32.totalorder %v2418_v32, 1024  ;;  %v1227_v8 = vsel %vm1177_vm2, %v1138_v25, 0.0 }
 0x124   : > { %v1139_v47 = vsel %vm301_vm14, %v796_v4, 0.0  ;;  %vm309_vm6 = vcmp.lt.s32.totalorder %v2460_v36, 1024  ;;  %v184_v12 = vadd.s32 304, %v2158_v7  ;;  %v187_v5 = vadd.s32 328, %v2158_v7 }
 0x125   : > { %v1423_v13 = vadd.f32 %v1422_v1, %v1421_v0  ;;  %v1228_v15 = vadd.f32 %v1227_v8, %v1226_v62  ;;  %v1229_v6 = vsel %vm1177_vm2, %v1139_v47, 0.0  ;;  %v1337_v19 = vmul.f32 %v1139_v47, %v1139_v47  ;;  %v1781_v29 = vpop.f32.mrb[28].mxu0 }
 0x126   : > { %v1424_v46 = vsel %vm1177_vm2, %v1336_v50, 0.0  ;;  %v1338_v20 = vmul.f32 %v1140_v3, %v1140_v3  ;;  %v2489_v25 = vadd.s32 %v2162_v9, %v185_v34  ;;  %v186_v30 = vadd.s32 320, %v2158_v7  ;;  %v806_v43 = vpop.f32.mrb[29].mxu0 }
 0x127   : > { %v1230_v52 = vadd.f32 %v1229_v6, %v1228_v15  ;;  %v1425_v24 = vadd.f32 %v1424_v46, %v1423_v13  ;;  %v1426_v42 = vsel %vm1177_vm2, %v1337_v19, 0.0  ;;  %v1142_v61 = vsel %vm304_vm15, %v1781_v29, 0.0 }
 0x128   : > { %v1231_v50 = vsel %vm1177_vm2, %v1140_v3, 0.0  ;;  %v1141_v49 = vsel %vm303_vm0, %v806_v43, 0.0  ;;  %vm310_vm7 = vcmp.lt.s32.totalorder %v2444_v38, 1024  ;;  %vm311_vm8 = vcmp.lt.s32.totalorder %v2469_v54, 1024 }
 0x129   : > { %v2505_v34 = vadd.s32 %v2162_v9, %v184_v12  ;;  %v2508_v62 = vadd.s32 %v2162_v9, %v187_v5  ;;  %v1427_v31 = vadd.f32 %v1426_v42, %v1425_v24  ;;  %v1232_v0 = vadd.f32 %v1231_v50, %v1230_v52  ;;  %v1784_v58 = vpop.f32.mrb[30].mxu0  ;;  %v2518_v12 = vpop.f32.mrb[26].mxu1 }
 0x12a   : > { %v1233_v1 = vsel %vm1177_vm2, %v1141_v49, 0.0  ;;  %v1339_v4 = vmul.f32 %v1141_v49, %v1141_v49  ;;  %v1428_v3 = vsel %vm1177_vm2, %v1338_v20, 0.0  ;;  %v1340_v8 = vmul.f32 %v1142_v61, %v1142_v61  ;;  %v816_v46 = vpop.f32.mrb[31].mxu0  ;;  %v2523_v20 = vpop.f32.mrb[27].mxu1 }
 0x12b   : > { %v1145_v47 = vsel %vm307_vm1, %v2230_v2, 0.0  ;;  %v2516_v13 = vadd.s32 %v2162_v9, %v186_v30  ;;  %v1234_v5 = vadd.f32 %v1233_v1, %v1232_v0  ;;  %v1429_v15 = vadd.f32 %v1428_v3, %v1427_v31  ;;  %v2537_v49 = vpop.f32.mrb[28].mxu1 }
 0x12c   : > { %v1430_v6 = vsel %vm1177_vm2, %v1339_v4, 0.0  ;;  %v1144_v19 = vsel %vm306_vm3, %v1784_v58, 0.0  ;;  %v1235_v29 = vsel %vm1177_vm2, %v1142_v61, 0.0  ;;  %v1143_v2 = vsel %vm305_vm4, %v816_v46, 0.0  ;;  %v2543_v3 = vpop.f32.mrb[29].mxu1 }
 0x12d   : > { %vm312_vm9 = vcmp.lt.s32.totalorder %v2463_v41, 1024  ;;  %vm313_vm10 = vcmp.lt.s32.totalorder %v2505_v34, 1024  ;;  %v189_v23 = vadd.s32 344, %v2158_v7  ;;  %v188_v30 = vadd.s32 336, %v2158_v7 }
 0x12e   : > { %v1431_v52 = vadd.f32 %v1430_v6, %v1429_v15  ;;  %v1236_v24 = vadd.f32 %v1235_v29, %v1234_v5  ;;  %v1237_v51 = vsel %vm1177_vm2, %v1143_v2, 0.0  ;;  %v1341_v42 = vmul.f32 %v1143_v2, %v1143_v2  ;;  %v2559_v29 = vpop.f32.mrb[30].mxu1 }
 0x12f   : > { %v1432_v43 = vsel %vm1177_vm2, %v1340_v8, 0.0  ;;  %v1342_v50 = vmul.f32 %v1144_v19, %v1144_v19  ;;  %v1146_v22 = vsel %vm308_vm5, %v2224_v60, 0.0  ;;  %v1343_v61 = vmul.f32 %v1145_v47, %v1145_v47 }
 0x130   : > { %v1238_v31 = vadd.f32 %v1237_v51, %v1236_v24  ;;  %v1433_v0 = vadd.f32 %v1432_v43, %v1431_v52  ;;  %v1434_v1 = vsel %vm1177_vm2, %v1341_v42, 0.0  ;;  %v1147_v4 = vsel %vm309_vm6, %v2256_v26, 0.0  ;;  %v2567_v24 = vpop.f32.mrb[31].mxu1 }
 0x131   : > { %v1239_v8 = vsel %vm1177_vm2, %v1144_v19, 0.0  ;;  %v1241_v58 = vsel %vm1177_vm2, %v1145_v47, 0.0  ;;  %vm314_vm11 = vcmp.lt.s32.totalorder %v2489_v25, 1024  ;;  %vm315_vm12 = vcmp.lt.s32.totalorder %v2516_v13, 1024 }
 0x132   : > { %v2550_v60 = vadd.s32 %v2162_v9, %v188_v30  ;;  %v190_v32 = vadd.s32 352, %v2158_v7  ;;  %v1435_v5 = vadd.f32 %v1434_v1, %v1433_v0  ;;  %v1240_v15 = vadd.f32 %v1239_v8, %v1238_v31 }
 0x133   : > { %v2554_v36 = vadd.s32 %v2162_v9, %v189_v23  ;;  %v191_v26 = vadd.s32 360, %v2158_v7  ;;  %v1436_v6 = vsel %vm1177_vm2, %v1342_v50, 0.0  ;;  %v1344_v19 = vmul.f32 %v1146_v22, %v1146_v22 }
 0x134   : > { %v1438_v47 = vsel %vm1177_vm2, %v1343_v61, 0.0  ;;  %v1345_v46 = vmul.f32 %v1147_v4, %v1147_v4  ;;  %v1242_v2 = vadd.f32 %v1241_v58, %v1240_v15  ;;  %v1437_v30 = vadd.f32 %v1436_v6, %v1435_v5 }
 0x135   : > { %v1148_v52 = vsel %vm310_vm7, %v2248_v18, 0.0  ;;  %v1149_v23 = vsel %vm311_vm8, %v2276_v48, 0.0  ;;  %v1243_v51 = vsel %vm1177_vm2, %v1146_v22, 0.0  ;;  %v1245_v42 = vsel %vm1177_vm2, %v1147_v4, 0.0 }
 0x136   : > { %vm316_vm13 = vcmp.lt.s32.totalorder %v2508_v62, 1024  ;;  %vm317_vm14 = vcmp.lt.s32.totalorder %v2550_v60, 1024  ;;  %v2574_v43 = vadd.s32 %v2162_v9, %v190_v32  ;;  %v192_v38 = vadd.s32 368, %v2158_v7 }
 0x137   : > { %v1439_v18 = vadd.f32 %v1438_v47, %v1437_v30  ;;  %v1244_v50 = vadd.f32 %v1243_v51, %v1242_v2  ;;  %v2578_v54 = vadd.s32 %v2162_v9, %v191_v26  ;;  %v193_v48 = vadd.s32 376, %v2158_v7 }
 0x138   : > { %v1440_v22 = vsel %vm1177_vm2, %v1344_v19, 0.0  ;;  %v1346_v61 = vmul.f32 %v1148_v52, %v1148_v52  ;;  %v1442_v31 = vsel %vm1177_vm2, %v1345_v46, 0.0  ;;  %v1347_v0 = vmul.f32 %v1149_v23, %v1149_v23 }
 0x139   : > { %v1246_v1 = vadd.f32 %v1245_v42, %v1244_v50  ;;  %v1441_v4 = vadd.f32 %v1440_v22, %v1439_v18  ;;  %v1150_v8 = vsel %vm312_vm9, %v2271_v40, 0.0  ;;  %v1151_v58 = vsel %vm313_vm10, %v2300_v10, 0.0 }
 0x13a   : > { %v1247_v32 = vsel %vm1177_vm2, %v1148_v52, 0.0  ;;  %v1249_v5 = vsel %vm1177_vm2, %v1149_v23, 0.0  ;;  %vm318_vm15 = vcmp.lt.s32.totalorder %v2554_v36, 1024  ;;  %vm319_vm0 = vcmp.lt.s32.totalorder %v2574_v43, 1024 }
 0x13b   : > { %v2594_v15 = vadd.s32 %v2162_v9, %v192_v38  ;;  %v194_v26 = vadd.s32 384, %v2158_v7  ;;  %v1443_v6 = vadd.f32 %v1442_v31, %v1441_v4  ;;  %v1248_v41 = vadd.f32 %v1247_v32, %v1246_v1 }
 0x13c   : > { %v2598_v40 = vadd.s32 %v2162_v9, %v193_v48  ;;  %v195_v10 = vadd.s32 392, %v2158_v7  ;;  %v1444_v34 = vsel %vm1177_vm2, %v1346_v61, 0.0  ;;  %v1348_v19 = vmul.f32 %v1150_v8, %v1150_v8 }
 0x13d   : > { %v1446_v47 = vsel %vm1177_vm2, %v1347_v0, 0.0  ;;  %v1349_v46 = vmul.f32 %v1151_v58, %v1151_v58  ;;  %v1250_v2 = vadd.f32 %v1249_v5, %v1248_v41  ;;  %v1445_v30 = vadd.f32 %v1444_v34, %v1443_v6 }
 0x13e   : > { %v1152_v52 = vsel %vm314_vm11, %v2295_v63, 0.0  ;;  %v1153_v23 = vsel %vm315_vm12, %v2320_v33, 0.0  ;;  %v1251_v51 = vsel %vm1177_vm2, %v1150_v8, 0.0  ;;  %v1253_v42 = vsel %vm1177_vm2, %v1151_v58, 0.0 }
 0x13f   : > { %vm320_vm1 = vcmp.lt.s32.totalorder %v2578_v54, 1024  ;;  %vm321_vm3 = vcmp.lt.s32.totalorder %v2594_v15, 1024  ;;  %v2614_v38 = vadd.s32 %v2162_v9, %v194_v26  ;;  %v1447_v18 = vadd.f32 %v1446_v47, %v1445_v30 }
 0x140   : > { %v1252_v50 = vadd.f32 %v1251_v51, %v1250_v2  ;;  %v2617_v25 = vadd.s32 %v2162_v9, %v195_v10  ;;  %v196_v63 = vadd.s32 400, %v2158_v7  ;;  %v1448_v33 = vsel %vm1177_vm2, %v1348_v19, 0.0 }
 0x141   : > { %v1350_v13 = vmul.f32 %v1152_v52, %v1152_v52  ;;  %v1450_v48 = vsel %vm1177_vm2, %v1349_v46, 0.0  ;;  %v1351_v22 = vmul.f32 %v1153_v23, %v1153_v23  ;;  %v1449_v31 = vadd.f32 %v1448_v33, %v1447_v18 }
 0x142   : > { %v1254_v61 = vadd.f32 %v1253_v42, %v1252_v50  ;;  %v1154_v0 = vsel %vm316_vm13, %v2315_v28, 0.0  ;;  %v1155_v1 = vsel %vm317_vm14, %v2344_v37, 0.0  ;;  %v1255_v4 = vsel %vm1177_vm2, %v1152_v52, 0.0 }
 0x143   : > { %v1257_v8 = vsel %vm1177_vm2, %v1153_v23, 0.0  ;;  %vm322_vm4 = vcmp.lt.s32.totalorder %v2598_v40, 1024  ;;  %vm323_vm5 = vcmp.lt.s32.totalorder %v2614_v38, 1024  ;;  %v197_v58 = vadd.s32 408, %v2158_v7 }
 0x144   : > { %v1451_v32 = vadd.f32 %v1450_v48, %v1449_v31  ;;  %v1256_v5 = vadd.f32 %v1255_v4, %v1254_v61  ;;  %v261_v26 = vadd.s32 %v2162_v9, %v196_v63  ;;  %v198_v28 = vadd.s32 416, %v2158_v7 }
 0x145   : > { %v1452_v62 = vsel %vm1177_vm2, %v1350_v13, 0.0  ;;  %v1352_v60 = vmul.f32 %v1154_v0, %v1154_v0  ;;  %v1454_v37 = vsel %vm1177_vm2, %v1351_v22, 0.0  ;;  %v1353_v6 = vmul.f32 %v1155_v1, %v1155_v1 }
 0x146   : > { %v1258_v41 = vadd.f32 %v1257_v8, %v1256_v5  ;;  %v1453_v10 = vadd.f32 %v1452_v62, %v1451_v32  ;;  %v1156_v34 = vsel %vm318_vm15, %v2339_v53, 0.0  ;;  %v1157_v19 = vsel %vm319_vm0, %v2364_v27, 0.0 }
 0x147   : > { %v1259_v47 = vsel %vm1177_vm2, %v1154_v0, 0.0  ;;  %v1261_v46 = vsel %vm1177_vm2, %v1155_v1, 0.0  ;;  %vm324_vm6 = vcmp.lt.s32.totalorder %v2617_v25, 1024  ;;  %v2647_v2 = vadd.s32 %v2162_v9, %v197_v58 }
 0x148   : > { %v199_v30 = vadd.s32 424, %v2158_v7  ;;  %v1455_v52 = vadd.f32 %v1454_v37, %v1453_v10  ;;  %v1260_v23 = vadd.f32 %v1259_v47, %v1258_v41  ;;  %vm325_vm7 = vcmp.lt.s32.totalorder %v261_v26, 1024 }
 0x149   : > { %v263_v53 = vadd.s32 %v2162_v9, %v198_v28  ;;  %v1456_v36 = vsel %vm1177_vm2, %v1352_v60, 0.0  ;;  %v1354_v43 = vmul.f32 %v1156_v34, %v1156_v34  ;;  %v1458_v27 = vsel %vm1177_vm2, %v1353_v6, 0.0 }
 0x14a   : > { %v1355_v51 = vmul.f32 %v1157_v19, %v1157_v19  ;;  %v1262_v42 = vadd.f32 %v1261_v46, %v1260_v23  ;;  %v1457_v18 = vadd.f32 %v1456_v36, %v1455_v52  ;;  %v1158_v50 = vsel %vm320_vm1, %v2359_v17, 0.0 }
 0x14b   : > { %v1159_v63 = vsel %vm321_vm3, %v2388_v55, 0.0  ;;  %v1263_v33 = vsel %vm1177_vm2, %v1156_v34, 0.0  ;;  %v1265_v13 = vsel %vm1177_vm2, %v1157_v19, 0.0  ;;  %vm326_vm8 = vcmp.lt.s32.totalorder %v2647_v2, 1024 }
 0x14c   : > { %v2663_v48 = vadd.s32 %v2162_v9, %v199_v30  ;;  %v201_v22 = vadd.s32 440, %v2158_v7  ;;  %v1459_v61 = vadd.f32 %v1458_v27, %v1457_v18  ;;  %v1264_v31 = vadd.f32 %v1263_v33, %v1262_v42 }
 0x14d   : > { %vm327_vm9 = vcmp.lt.s32.totalorder %v263_v53, 1024  ;;  %v200_v17 = vadd.s32 432, %v2158_v7  ;;  %v1460_v54 = vsel %vm1177_vm2, %v1354_v43, 0.0  ;;  %v1356_v15 = vmul.f32 %v1158_v50, %v1158_v50 }
 0x14e   : > { %v1462_v55 = vsel %vm1177_vm2, %v1355_v51, 0.0  ;;  %v1357_v0 = vmul.f32 %v1159_v63, %v1159_v63  ;;  %v1266_v1 = vadd.f32 %v1265_v13, %v1264_v31  ;;  %v1461_v4 = vadd.f32 %v1460_v54, %v1459_v61 }
 0x14f   : > { %v1160_v8 = vsel %vm322_vm4, %v2383_v44, 0.0  ;;  %v1161_v58 = vsel %vm323_vm5, %v2408_v21, 0.0  ;;  %v1267_v32 = vsel %vm1177_vm2, %v1158_v50, 0.0  ;;  %v1269_v5 = vsel %vm1177_vm2, %v1159_v63, 0.0 }
 0x150   : > { %vm328_vm10 = vcmp.lt.s32.totalorder %v2663_v48, 1024  ;;  %v2679_v28 = vadd.s32 %v2162_v9, %v201_v22  ;;  %v203_v62 = vadd.s32 456, %v2158_v7  ;;  %v1463_v60 = vadd.f32 %v1462_v55, %v1461_v4 }
 0x151   : > { %v1268_v37 = vadd.f32 %v1267_v32, %v1266_v1  ;;  %v265_v40 = vadd.s32 %v2162_v9, %v200_v17  ;;  %v202_v44 = vadd.s32 448, %v2158_v7  ;;  %v1464_v38 = vsel %vm1177_vm2, %v1356_v15, 0.0 }
 0x152   : > { %v1358_v21 = vmul.f32 %v1160_v8, %v1160_v8  ;;  %v1466_v6 = vsel %vm1177_vm2, %v1357_v0, 0.0  ;;  %v1359_v41 = vmul.f32 %v1161_v58, %v1161_v58  ;;  %v1465_v34 = vadd.f32 %v1464_v38, %v1463_v60 }
 0x153   : > { %v1270_v10 = vadd.f32 %v1269_v5, %v1268_v37  ;;  %v1162_v19 = vsel %vm324_vm6, %v2403_v14, 0.0  ;;  %v1163_v47 = vsel %vm325_vm7, %v2432_v57, 0.0  ;;  %v1271_v46 = vsel %vm1177_vm2, %v1160_v8, 0.0 }
 0x154   : > { %v1273_v30 = vsel %vm1177_vm2, %v1161_v58, 0.0  ;;  %vm330_vm11 = vcmp.lt.s32.totalorder %v2679_v28, 1024  ;;  %v268_v52 = vadd.s32 %v2162_v9, %v203_v62  ;;  %v205_v23 = vadd.s32 472, %v2158_v7 }
 0x155   : > { %v1467_v36 = vadd.f32 %v1466_v6, %v1465_v34  ;;  %v1272_v43 = vadd.f32 %v1271_v46, %v1270_v10  ;;  %vm329_vm12 = vcmp.lt.s32.totalorder %v265_v40, 1024  ;;  %v267_v27 = vadd.s32 %v2162_v9, %v202_v44 }
 0x156   : > { %v1468_v14 = vsel %vm1177_vm2, %v1358_v21, 0.0  ;;  %v1360_v25 = vmul.f32 %v1162_v19, %v1162_v19  ;;  %v1470_v57 = vsel %vm1177_vm2, %v1359_v41, 0.0  ;;  %v1361_v26 = vmul.f32 %v1163_v47, %v1163_v47 }
 0x157   : > { %v1274_v51 = vadd.f32 %v1273_v30, %v1272_v43  ;;  %v1469_v42 = vadd.f32 %v1468_v14, %v1467_v36  ;;  %v1164_v18 = vsel %vm326_vm8, %v2427_v45, 0.0  ;;  %v1165_v50 = vsel %vm327_vm9, %v2453_v35, 0.0 }
 0x158   : > { %v1275_v63 = vsel %vm1177_vm2, %v1162_v19, 0.0  ;;  %v1277_v33 = vsel %vm1177_vm2, %v1163_v47, 0.0  ;;  %vm332_vm13 = vcmp.lt.s32.totalorder %v268_v52, 1024  ;;  %v270_v13 = vadd.s32 %v2162_v9, %v205_v23 }
 0x159   : > { %v204_v22 = vadd.s32 464, %v2158_v7  ;;  %v1471_v61 = vadd.f32 %v1470_v57, %v1469_v42  ;;  %v1276_v31 = vadd.f32 %v1275_v63, %v1274_v51  ;;  %vm331_vm14 = vcmp.lt.s32.totalorder %v267_v27, 1024 }
 0x15a   : > { %v206_v17 = vadd.s32 480, %v2158_v7  ;;  %v1472_v2 = vsel %vm1177_vm2, %v1360_v25, 0.0  ;;  %v1362_v45 = vmul.f32 %v1164_v18, %v1164_v18  ;;  %v1474_v53 = vsel %vm1177_vm2, %v1361_v26, 0.0 }
 0x15b   : > { %v1363_v35 = vmul.f32 %v1165_v50, %v1165_v50  ;;  %v1278_v54 = vadd.f32 %v1277_v33, %v1276_v31  ;;  %v1473_v15 = vadd.f32 %v1472_v2, %v1471_v61  ;;  %v1166_v55 = vsel %vm328_vm10, %v2447_v16, 0.0 }
 0x15c   : > { %v1167_v0 = vsel %vm329_vm12, %v2478_v39, 0.0  ;;  %v1279_v1 = vsel %vm1177_vm2, %v1164_v18, 0.0  ;;  %v1281_v4 = vsel %vm1177_vm2, %v1165_v50, 0.0  ;;  %vm334_vm15 = vcmp.lt.s32.totalorder %v270_v13, 1024 }
 0x15d   : > { %v269_v8 = vadd.s32 %v2162_v9, %v204_v22  ;;  %v1475_v58 = vadd.f32 %v1474_v53, %v1473_v15  ;;  %v1280_v32 = vadd.f32 %v1279_v1, %v1278_v54  ;;  %v207_v5 = vadd.s32 488, %v2158_v7 }
 0x15e   : > { %v271_v62 = vadd.s32 %v2162_v9, %v206_v17  ;;  %v1476_v60 = vsel %vm1177_vm2, %v1362_v45, 0.0  ;;  %v1364_v48 = vmul.f32 %v1166_v55, %v1166_v55  ;;  %v1478_v16 = vsel %vm1177_vm2, %v1363_v35, 0.0 }
 0x15f   : > { %v1365_v37 = vmul.f32 %v1167_v0, %v1167_v0  ;;  %v1282_v39 = vadd.f32 %v1281_v4, %v1280_v32  ;;  %v1477_v40 = vadd.f32 %v1476_v60, %v1475_v58  ;;  %v1168_v44 = vsel %vm330_vm11, %v2472_v56, 0.0 }
 0x160   : > { %v1169_v38 = vsel %vm331_vm14, %v2497_v59, 0.0  ;;  %v1283_v21 = vsel %vm1177_vm2, %v1166_v55, 0.0  ;;  %v1285_v6 = vsel %vm1177_vm2, %v1167_v0, 0.0  ;;  %vm333_vm0 = vcmp.lt.s32.totalorder %v269_v8, 1024 }
 0x161   : > { %v208_v41 = vadd.s32 496, %v2158_v7  ;;  %v1479_v10 = vadd.f32 %v1478_v16, %v1477_v40  ;;  %v1284_v34 = vadd.f32 %v1283_v21, %v1282_v39  ;;  %v272_v19 = vadd.s32 %v2162_v9, %v207_v5 }
 0x162   : > { %vm335_vm1 = vcmp.lt.s32.totalorder %v271_v62, 1024  ;;  %v1480_v47 = vsel %vm1177_vm2, %v1364_v48, 0.0  ;;  %v1366_v46 = vmul.f32 %v1168_v44, %v1168_v44  ;;  %v1482_v56 = vsel %vm1177_vm2, %v1365_v37, 0.0 }
 0x163   : > { %v1367_v28 = vmul.f32 %v1169_v38, %v1169_v38  ;;  %v1286_v30 = vadd.f32 %v1285_v6, %v1284_v34  ;;  %v1481_v59 = vadd.f32 %v1480_v47, %v1479_v10  ;;  %v1170_v23 = vsel %vm332_vm13, %v2492_v11, 0.0 }
 0x164   : > { %v1171_v36 = vsel %vm333_vm0, %v2523_v20, 0.0  ;;  %v1287_v43 = vsel %vm1177_vm2, %v1168_v44, 0.0  ;;  %v1289_v27 = vsel %vm1177_vm2, %v1169_v38, 0.0  ;;  %v209_v14 = vadd.s32 504, %v2158_v7 }
 0x165   : > { %v273_v25 = vadd.s32 %v2162_v9, %v208_v41  ;;  %v1483_v57 = vadd.f32 %v1482_v56, %v1481_v59  ;;  %v1288_v26 = vadd.f32 %v1287_v43, %v1286_v30  ;;  %vm336_vm3 = vcmp.lt.s32.totalorder %v272_v19, 1024 }
 0x166   : > { %v1484_v51 = vsel %vm1177_vm2, %v1366_v46, 0.0  ;;  %v1368_v42 = vmul.f32 %v1170_v23, %v1170_v23  ;;  %v1486_v18 = vsel %vm1177_vm2, %v1367_v28, 0.0  ;;  %v1369_v52 = vmul.f32 %v1171_v36, %v1171_v36 }
 0x167   : > { %v1290_v11 = vadd.f32 %v1289_v27, %v1288_v26  ;;  %v1485_v50 = vadd.f32 %v1484_v51, %v1483_v57  ;;  %v1172_v20 = vsel %vm334_vm15, %v2518_v12, 0.0  ;;  %v1173_v63 = vsel %vm335_vm1, %v2543_v3, 0.0 }
 0x168   : > { %v1291_v7 = vsel %vm1177_vm2, %v1170_v23, 0.0  ;;  %v1293_v33 = vsel %vm1177_vm2, %v1171_v36, 0.0  ;;  %v274_v22 = vadd.s32 %v2162_v9, %v209_v14  ;;  %vm337_vm4 = vcmp.lt.s32.totalorder %v273_v25, 1024 }
 0x169   : > { %v1487_v61 = vadd.f32 %v1486_v18, %v1485_v50  ;;  %v1292_v31 = vadd.f32 %v1291_v7, %v1290_v11  ;;  %v1488_v17 = vsel %vm1177_vm2, %v1368_v42, 0.0  ;;  %v1370_v2 = vmul.f32 %v1172_v20, %v1172_v20 }
 0x16a   : > { %v1490_v45 = vsel %vm1177_vm2, %v1369_v52, 0.0  ;;  %v1371_v53 = vmul.f32 %v1173_v63, %v1173_v63  ;;  %v1174_v3 = vsel %vm336_vm3, %v2537_v49, 0.0  ;;  %v1175_v35 = vsel %vm337_vm4, %v2567_v24, 0.0 }
 0x16b   : > { %v1294_v13 = vadd.f32 %v1293_v33, %v1292_v31  ;;  %v1489_v12 = vadd.f32 %v1488_v17, %v1487_v61  ;;  %v1295_v54 = vsel %vm1177_vm2, %v1172_v20, 0.0  ;;  %v1297_v9 = vsel %vm1177_vm2, %v1173_v63, 0.0 }
 0x16c   : > { %vm338_vm5 = vcmp.lt.s32.totalorder %v274_v22, 1024  ;;  %v1492_v0 = vsel %vm1177_vm2, %v1370_v2, 0.0  ;;  %v1372_v1 = vmul.f32 %v1174_v3, %v1174_v3  ;;  %v1494_v4 = vsel %vm1177_vm2, %v1371_v53, 0.0 }
 0x16d   : > { %v1491_v15 = vadd.f32 %v1490_v45, %v1489_v12  ;;  %v1296_v55 = vadd.f32 %v1295_v54, %v1294_v13  ;;  %v1373_v8 = vmul.f32 %v1175_v35, %v1175_v35  ;;  %v1176_v5 = vsel %vm338_vm5, %v2559_v29, 0.0 }
 0x16e   : > { %v1299_v49 = vsel %vm1177_vm2, %v1174_v3, 0.0  ;;  %v1301_v24 = vsel %vm1177_vm2, %v1175_v35, 0.0  ;;  %v1496_v48 = vsel %vm1177_vm2, %v1372_v1, 0.0  ;;  %v1374_v16 = vmul.f32 %v1176_v5, %v1176_v5 }
 0x16f   : > { %v1298_v58 = vadd.f32 %v1297_v9, %v1296_v55  ;;  %v1493_v32 = vadd.f32 %v1492_v0, %v1491_v15  ;;  %v1498_v37 = vsel %vm1177_vm2, %v1373_v8, 0.0  ;;  %v1303_v44 = vsel %vm1177_vm2, %v1176_v5, 0.0 }
 0x170   : > { %v1500_v29 = vsel %vm1177_vm2, %v1374_v16, 0.0  ;;  %vm1508_vm6 = vcmask 1040384   ;;  %vm1510_vm2 = vcmask 58368  }
 0x171   : > { %v1495_v62 = vadd.f32 %v1494_v4, %v1493_v32  ;;  %v1300_v60 = vadd.f32 %v1299_v49, %v1298_v58 }
 0x173   : > { %v1302_v39 = vadd.f32 %v1301_v24, %v1300_v60  ;;  %v1497_v40 = vadd.f32 %v1496_v48, %v1495_v62 }
 0x175   : > { %v1304_v38 = vadd.f32 %v1303_v44, %v1302_v39  ;;  %v1499_v21 = vadd.f32 %v1498_v37, %v1497_v40 }
 0x177   : > { %v1305_v6 = vrot.slane %v1304_v38, 4  ;;  %v1501_v41 = vadd.f32 %v1500_v29, %v1499_v21 }
 0x179   : > { %v1306_v10 = vadd.f32 %v1305_v6, %v1304_v38  ;;  %v1502_v34 = vrot.slane %v1501_v41, 4 }
 0x17b   : > { %v1307_v19 = vrot.slane %v1306_v10, 2  ;;  %v1503_v47 = vadd.f32 %v1502_v34, %v1501_v41 }
 0x17d   : > { %v1308_v46 = vadd.f32 %v1307_v19, %v1306_v10  ;;  %v1504_v56 = vrot.slane %v1503_v47, 2 }
 0x17f   : > { %v1309_v28 = vrot.slane %v1308_v46, 1  ;;  %v1505_v30 = vadd.f32 %v1504_v56, %v1503_v47 }
 0x181   : > { %v1506_v59 = vrot.slane %v1505_v30, 1  ;;  %v1310_v23 = vadd.f32 %v1309_v28, %v1308_v46 }
 0x183   : > { %v1507_v36 = vadd.f32 %v1506_v59, %v1505_v30 }
 0x185   : > { %v1509_v43 = vsel %vm1508_vm6, %v1310_v23, %v1507_v36 }
 0x186   : > { %1511 = vst.msk [vmem:[%s137_s16] sm:$0x3] %vm1510_vm2, %v1509_v43 }
 0x187   : > { %1897 = shalt.err (!%p1894_p3)
}
 0x188   : > { %s1898_s28 = scalar_lea.hbm %s2771_s23, 32  ;;  %s1902_s3 = scalar_lea.hbm %s2815_s2, 64 }
 0x189   : > { %p1899_p4 = scmp.ne.s32.totalorder %s2771_s23, %s1898_s28  ;;  %p1903_p9 = scmp.lt.u32.totalorder %s2771_s23, %s2815_s2 }
 0x18a   : > { %p1904_p10 = scmp.lt.u32.totalorder %s1902_s3, %s1898_s28  ;;  %p1906_p12 = scmp.lt.u32.totalorder %s1898_s28, %s2771_s23 }
 0x18b   : > { %p1900_p7 = pnand %p1899_p4, %p2002_p5 }
 0x18c   : > { %p1905_p11 = por %p1904_p10, %p1903_p9 }
 0x18d   : > { %p1901_p8 = pneg %p1900_p7 }
 0x18e   : > { %p1907_p13 = por %p1906_p12, %p1905_p11 }
 0x190   : > { %p1908_p0 = pnand %p1907_p13, %p1901_p8 }
 0x192   : > { %1911 = shalt.err (!%p1908_p0)
}
 0x193   : > { %1845 = dma.vmem_to_hbm [thread:$0]  (%p2002_p5), %s2773_s17, 32, %s2771_s23, %s1513_s24  }
 0x194 PF: > { %p1851_p1 = scmp.ge.s32.totalorder %s1946_s12, 2  ;;  %s1538_s6 = sand.u32 1, %s1934_s9  }
 0x195   : > { %s1539_s7 = scalar_lea.sflag [#allocation3], %s1538_s6 }
 0x196   : > { %p1848_p2 = pnand %p1851_p1, %p2006_p6 }
 0x198   : > { %1929 = dma.done.wait (!%p1848_p2), %s1539_s7, 32  }
 0x199   : > { %1931 = vsyncadd (!%p1848_p2), %s1539_s7, 4294967264  ;;  %p12_p3 = scmp.ge.s32.totalorder %s1989_s15, 4   ;;  %s2818_s9 = smov %s1938_s10 }
 0x19a   : > { %s2819_s10 = smov %s1942_s11  ;;  %s2820_s11 = smov %s2000_s18 }
 0x19b   : > { %s2821_s12 = smov %s1989_s15  ;;  %14 = sbr.rel (!%p12_p3) target bundleno = 3 (0x3), region = 63 }
 0x1a2   :  { %1544 = vsyncpa [#allocation3], 1 }
 0x1a3   :  { %1546 = vsyncpa [#allocation3 + $0x1], 1 }

</bundles_post_ra>
